<compile_context>
chip_gen: v7x
topology: tpu7x:2x2x1
jax: 0.10.0
libtpu: 0.0.40
codegen_flags: <defaults>
</compile_context>

<pallas_src>
import jax
import jax.numpy as jnp
from jax import lax
from jax.experimental import pallas as pl
from jax.experimental.pallas import tpu as pltpu

NUM_FILTERS = 32      # channel_size
CLASS_NUM = 4         # num_class
SEQ_LEN = 16
NUM_CHANNELS = 2      # init_channel == 2 -> static + non-static embedding stack
EMBED_DIM = 32
VOCAB = 50
BATCH = 2
BN_EPS = 1e-5
NUM_RESNET = 3                      # 16 -> 8 -> 4 -> 2
FINAL_LEN = SEQ_LEN >> NUM_RESNET   # 2

# conv-weight slab slot indices (each slot is a tap-fused (3*NF, NF) matrix)
W_REGION, W_CB1, W_CB2 = 0, 1, 2    # resnet r: conv1 = 3 + 2r, conv2 = 4 + 2r

# (1, NF)-vector slab row indices
V_BR, V_CB1S, V_CB1B, V_BC1, V_CB2S, V_CB2B, V_BC2, V_BSC = range(8)
V_RES_BASE = 8                      # + 6*r: [bn1s, bn1b, b1, bn2s, bn2b, b2]


def _round8(n):
    return max(8, ((n + 7) // 8) * 8)


# ------------------------------ fused kernel ----------------------------------
def dpcnn_kernel(x_ref, wconv_ref, wsc_ref, vec_ref, wfc1_ref, fcs_ref, o_ref):
    B, NF, CLS = BATCH, NUM_FILTERS, CLASS_NUM
    f32 = jnp.float32

    def vec(k):                                  # (1, NF) broadcast row
        return vec_ref[k:k + 1, :]

    def local_pos(rows, L):
        r = lax.broadcasted_iota(jnp.int32, (rows, NF), 0)
        return jnp.bitwise_and(r, L - 1)         # L is a power of two

    def conv_masks(rows, L):
        loc = local_pos(rows, L)
        return loc > 0, loc < (L - 1)

    def conv3(h, masks, w_slot, bias_row):
        # kernel_size=3, padding=1 conv over the batch-folded length axis,
        # fused into ONE MXU matmul: the three shifted copies are concatenated
        # on the lane axis and hit the tap-fused (3*Cin, NF) weight once.
        m_prev, m_next = masks
        rows = h.shape[0]
        h_prev = jnp.where(m_prev, pltpu.roll(h, shift=1, axis=0), 0.0)
        h_next = jnp.where(m_next, pltpu.roll(h, shift=rows - 1, axis=0), 0.0)
        h_cat = jnp.concatenate([h_prev, h, h_next], axis=-1)   # (rows, 3*Cin)
        return (jnp.dot(h_cat, wconv_ref[w_slot],
                        preferred_element_type=f32) + vec(bias_row))

    def maxpool3_s2(x, L, rows_out):
        # ConstantPad1d((0, 1), 0) + MaxPool1d(kernel=3, stride=2), batch
        # folded; local-position masks keep windows inside each batch element
        # and reproduce the zero right-pad (which participates in the max).
        rows = x.shape[0]
        loc = local_pos(rows, L)
        x1 = jnp.where(loc < L - 1, pltpu.roll(x, shift=rows - 1, axis=0), 0.0)
        x2 = jnp.where(loc < L - 2, pltpu.roll(x, shift=rows - 2, axis=0), 0.0)
        m = jnp.maximum(jnp.maximum(x, x1), x2)
        # Even-row downsample (out row p <- in row 2p).  Kept as one tiny
        # selection matmul per block: a strided-sublane read would need a VMEM
        # round trip and is a lowering risk for marginal gain at these shapes.
        rr = lax.broadcasted_iota(jnp.int32, (rows_out, rows), 0)
        cc = lax.broadcasted_iota(jnp.int32, (rows_out, rows), 1)
        sel = (cc == 2 * rr).astype(f32)          # rows past 2B*L/2 select nothing
        return jnp.dot(sel, m, preferred_element_type=f32)

    # ---- region embedding: conv (BN folded) + ReLU (Dropout = identity) ----
    L = SEQ_LEN
    masks = conv_masks(B * L, L)
    pre = jnp.maximum(conv3(x_ref[...], masks, W_REGION, V_BR), 0.0)   # (B*S, NF)

    # ---- conv_block (BN,ReLU,Conv,BN,ReLU,Conv) + Linear shortcut on pre ----
    t = jnp.maximum(pre * vec(V_CB1S) + vec(V_CB1B), 0.0)
    t = conv3(t, masks, W_CB1, V_BC1)
    t = jnp.maximum(t * vec(V_CB2S) + vec(V_CB2B), 0.0)
    t = conv3(t, masks, W_CB2, V_BC2)
    x = (jnp.dot(pre, wsc_ref[...], preferred_element_type=f32)
         + vec(V_BSC) + t)

    # ---- resnet blocks (statically unrolled; per-element length 16->8->4->2;
    #      row counts padded to a multiple of 8 so every roll stays tile-sized;
    #      padded rows hold junk that never leaks into real rows) ----
    for r in range(NUM_RESNET):
        L_out = L // 2
        rows_out = _round8(B * L_out)
        pooled = maxpool3_s2(x, L, rows_out)
        masks = conv_masks(rows_out, L_out)
        base = V_RES_BASE + 6 * r
        t = jnp.maximum(pooled * vec(base) + vec(base + 1), 0.0)
        t = conv3(t, masks, 3 + 2 * r, base + 2)
        t = jnp.maximum(t * vec(base + 3) + vec(base + 4), 0.0)
        t = conv3(t, masks, 4 + 2 * r, base + 5)
        x = t + pooled
        L = L_out

    # ---- fc head: channel-major flatten baked into wfc1, BN after fc1 folded,
    #      Dropout = identity.  Row b*FINAL_LEN + l holds (batch b, position l);
    #      the l-sum is one roll + add, so fc1 is two full-M matmuls instead of
    #      a Python loop of M=1 matmuls. ----
    rows = x.shape[0]
    t0 = jnp.dot(x, wfc1_ref[0:NF, :], preferred_element_type=f32)       # l = 0
    t1 = jnp.dot(pltpu.roll(x, shift=rows - 1, axis=0),
                 wfc1_ref[NF:2 * NF, :], preferred_element_type=f32)     # l = 1
    y = jnp.maximum(t0 + t1 + fcs_ref[0:1, :], 0.0)                      # (rows, CLS)
    out_all = (jnp.dot(y, fcs_ref[1:1 + CLS, :], preferred_element_type=f32)
               + fcs_ref[1 + CLS:2 + CLS, :])
    for b in range(B):                    # batch b's logits live in row b*FINAL_LEN
        o_ref[b:b + 1, :] = out_all[b * FINAL_LEN:b * FINAL_LEN + 1, :]


# ------------------------------ pallas wrapper --------------------------------
def _full_spec(shape):
    nd = len(shape)
    return pl.BlockSpec(shape, lambda i, nd=nd: (0,) * nd)


def dpcnn_pallas(x_fold, kp):
    wconv, wsc, vec, wfc1, fcs = kp
    return pl.pallas_call(
        dpcnn_kernel,
        out_shape=jax.ShapeDtypeStruct((BATCH, CLASS_NUM), jnp.float32),
        grid=(1,),                         # single fused step (batch is folded)
        in_specs=[_full_spec(x_fold.shape), _full_spec(wconv.shape),
                  _full_spec(wsc.shape), _full_spec(vec.shape),
                  _full_spec(wfc1.shape), _full_spec(fcs.shape)],
        out_specs=_full_spec((BATCH, CLASS_NUM)),
        compiler_params=pltpu.CompilerParams(
            dimension_semantics=("arbitrary",)),
    )(x_fold, wconv, wsc, vec, wfc1, fcs)


# --------------------------- one-time parameter prep ---------------------------
def _bn_fold(bn):
    g, b, m, v = bn
    s = g / jnp.sqrt(v + BN_EPS)
    return s, b - m * s


def prepare_params(P):
    """Host-side, one-time prep: BN folding, channel fold, tap fusion, packing."""
    NF, E, CLS = NUM_FILTERS, EMBED_DIM, CLASS_NUM
    assert E == NF, "conv-weight slab packing assumes EMBED_DIM == NUM_FILTERS"
    R = len(P['resnet'])
    assert R == NUM_RESNET and (SEQ_LEN >> R) == FINAL_LEN == 2

    # Region conv: fold the static / non-static embedding channel (exact only
    # while the two tables are identical, which holds in this eval setup) and
    # fold the following BatchNorm (conv -> BN -> ReLU).
    rs, rsh = _bn_fold(P['bn_region'])
    wr = jnp.transpose(P['w_region'], (2, 1, 3, 0)).sum(axis=1)   # (3, E, NF)
    wr = wr * rs[None, None, :]
    br = P['b_region'] * rs + rsh

    def tap_fuse(w_kio):                        # (3, Cin, NF) -> (3*Cin, NF)
        return w_kio.reshape(3 * w_kio.shape[1], w_kio.shape[2])

    conv_slots = [tap_fuse(wr),
                  tap_fuse(jnp.transpose(P['w_cb1'][..., 0], (2, 1, 0))),
                  tap_fuse(jnp.transpose(P['w_cb2'][..., 0], (2, 1, 0)))]
    for blk in P['resnet']:
        conv_slots.append(tap_fuse(jnp.transpose(blk['w1'], (2, 1, 0))))
        conv_slots.append(tap_fuse(jnp.transpose(blk['w2'], (2, 1, 0))))
    wconv = jnp.stack(conv_slots)               # (3 + 2R, 3*NF, NF)

    cb1s, cb1b = _bn_fold(P['bn_cb1'])
    cb2s, cb2b = _bn_fold(P['bn_cb2'])
    rows = [br, cb1s, cb1b, P['b_cb1'], cb2s, cb2b, P['b_cb2'], P['b_sc']]
    for blk in P['resnet']:
        b1s, b1b = _bn_fold(blk['bn1'])
        b2s, b2b = _bn_fold(blk['bn2'])
        rows += [b1s, b1b, blk['b1'], b2s, b2b, blk['b2']]
    vec = jnp.stack(rows)                       # (8 + 6R, NF)

    # fc1 with the channel-major flatten baked into a (FINAL_LEN*NF, CLS)
    # weight (rows l*NF + c) and its BatchNorm folded in; fc2 + biases packed
    # into one small (2 + CLS, CLS) slab.
    fs, fsh = _bn_fold(P['bn_fc'])
    wfc1 = jnp.transpose(P['w_fc1'].reshape(CLS, NF, FINAL_LEN), (2, 1, 0))
    wfc1 = (wfc1 * fs[None, None, :]).reshape(FINAL_LEN * NF, CLS)
    bfc1 = P['b_fc1'] * fs + fsh
    fcs = jnp.concatenate([bfc1[None, :], P['w_fc2'].T, P['b_fc2'][None, :]],
                          axis=0)               # (2 + CLS, CLS)

    kp = (wconv, P['w_sc'].T, vec, wfc1, fcs)
    return {'pretrained': P['pretrained'], 'kparams': kp}


# ------------------------------- forward (glue) --------------------------------
@jax.jit
def dpcnn_forward(ids, pretrained, kparams):
    B, S = ids.shape
    # Embedding lookup stays in XLA glue; the duplicated static/non-static
    # channel is folded into the region-conv weight so no stack/reshape is left.
    # TODO(synk): pull this gather into the kernel (scalar-prefetched ids +
    # manual DMA row gather) if the separate XLA gather dispatch ever matters.
    x = pretrained[ids].reshape(B * S, EMBED_DIM)          # (B*S, E) batch-folded
    return dpcnn_pallas(x, kparams)


# ----------------------------- pure-JAX reference -------------------------------
def _bn_eval(x, g, b, m, v, axis):
    shp = [1] * x.ndim
    shp[axis] = -1
    g, b, m, v = (t.reshape(shp) for t in (g, b, m, v))
    return (x - m) / jnp.sqrt(v + BN_EPS) * g + b


def reference_forward(ids, P):
    emb = P['pretrained'][ids]
    x = jnp.transpose(jnp.stack([emb, emb], axis=2), (0, 2, 1, 3))      # (B, 2, S, E)
    r = lax.conv_general_dilated(x, P['w_region'], (1, 1), ((1, 1), (0, 0)),
                                 dimension_numbers=('NCHW', 'OIHW', 'NCHW'))
    r = r + P['b_region'].reshape(1, -1, 1, 1)
    r = jnp.maximum(_bn_eval(r, *P['bn_region'], axis=1), 0.0)
    pre_act = jnp.transpose(jnp.squeeze(jnp.maximum(r, 0.0), 3), (0, 2, 1))
    t = jnp.maximum(_bn_eval(r, *P['bn_cb1'], axis=1), 0.0)
    t = lax.conv_general_dilated(t, P['w_cb1'], (1, 1), ((1, 1), (0, 0)),
                                 dimension_numbers=('NCHW', 'OIHW', 'NCHW'))
    t = t + P['b_cb1'].reshape(1, -1, 1, 1)
    t = jnp.maximum(_bn_eval(t, *P['bn_cb2'], axis=1), 0.0)
    t = lax.conv_general_dilated(t, P['w_cb2'], (1, 1), ((1, 1), (0, 0)),
                                 dimension_numbers=('NCHW', 'OIHW', 'NCHW'))
    t = t + P['b_cb2'].reshape(1, -1, 1, 1)
    cb = jnp.transpose(jnp.squeeze(t, 3), (0, 2, 1))
    sc = pre_act @ P['w_sc'].T + P['b_sc']
    x = jnp.transpose(sc + cb, (0, 2, 1))                               # (B, NF, S)
    for blk in P['resnet']:
        xp = jnp.pad(x, ((0, 0), (0, 0), (0, 1)))
        shortcut = lax.reduce_window(xp, -jnp.inf, lax.max, (1, 1, 3), (1, 1, 2), 'VALID')
        t = jnp.maximum(_bn_eval(shortcut, *blk['bn1'], axis=1), 0.0)
        t = lax.conv_general_dilated(t, blk['w1'], (1,), ((1, 1),),
                                     dimension_numbers=('NCH', 'OIH', 'NCH'))
        t = t + blk['b1'].reshape(1, -1, 1)
        t = jnp.maximum(_bn_eval(t, *blk['bn2'], axis=1), 0.0)
        t = lax.conv_general_dilated(t, blk['w2'], (1,), ((1, 1),),
                                     dimension_numbers=('NCH', 'OIH', 'NCH'))
        t = t + blk['b2'].reshape(1, -1, 1)
        x = t + shortcut
    x = x.reshape(x.shape[0], -1)
    y = x @ P['w_fc1'].T + P['b_fc1']
    y = jnp.maximum(_bn_eval(y, *P['bn_fc'], axis=1), 0.0)
    return y @ P['w_fc2'].T + P['b_fc2']


# ----------------------------------- params -------------------------------------
def init_params(key):
    state = {'key': key}

    def take():
        state['key'], sub = jax.random.split(state['key'])
        return sub

    def w(shape, scale=0.1):
        return scale * jax.random.normal(take(), shape, dtype=jnp.float32)

    def bn(n):
        g = 1.0 + 0.1 * jax.random.normal(take(), (n,), dtype=jnp.float32)
        b = 0.1 * jax.random.normal(take(), (n,), dtype=jnp.float32)
        m = 0.1 * jax.random.normal(take(), (n,), dtype=jnp.float32)
        v = 0.9 + 0.2 * jax.random.uniform(take(), (n,), dtype=jnp.float32)
        return (g, b, m, v)

    NF, C, E = NUM_FILTERS, NUM_CHANNELS, EMBED_DIM
    P = dict(
        pretrained=w((VOCAB, E), 1.0),
        w_region=w((NF, C, 3, E)), b_region=w((NF,)), bn_region=bn(NF),
        bn_cb1=bn(NF), w_cb1=w((NF, NF, 3, 1)), b_cb1=w((NF,)),
        bn_cb2=bn(NF), w_cb2=w((NF, NF, 3, 1)), b_cb2=w((NF,)),
        w_sc=w((NF, NF)), b_sc=w((NF,)),
        resnet=[], bn_fc=bn(CLASS_NUM),
    )
    seq = SEQ_LEN
    while seq > 2:
        P['resnet'].append(dict(bn1=bn(NF), w1=w((NF, NF, 3)), b1=w((NF,)),
                                bn2=bn(NF), w2=w((NF, NF, 3)), b2=w((NF,))))
        seq //= 2
    P['w_fc1'] = w((CLASS_NUM, NF * seq))
    P['b_fc1'] = w((CLASS_NUM,))
    P['w_fc2'] = w((CLASS_NUM, CLASS_NUM))
    P['b_fc2'] = w((CLASS_NUM,))
    return P


if __name__ == "__main__":
    root = jax.random.PRNGKey(0)
    k_params, k_ids = jax.random.split(root)
    P = init_params(k_params)
    prep = prepare_params(P)          # one-time: folds + tap fusion + packing
    ids = jax.random.randint(k_ids, (BATCH, SEQ_LEN), 0, VOCAB)

    out = jax.block_until_ready(
        dpcnn_forward(ids, prep['pretrained'], prep['kparams']))
    ref = jax.block_until_ready(reference_forward(ids, P))

    assert out.shape == (BATCH, CLASS_NUM)
    assert jnp.all(jnp.isfinite(out))
    assert jnp.allclose(out, ref, atol=1e-3, rtol=1e-3)
    print("KERNEL_OK")
</pallas_src>

<mosaic_0001>
module attributes {stable_mosaic.version = 11 : i64} {
  func.func @dpcnn_kernel(%arg0: i32, %arg1: memref<32x32xf32, #tpu.memory_space<vmem>>, %arg2: memref<9x96x32xf32, #tpu.memory_space<vmem>>, %arg3: memref<32x32xf32, #tpu.memory_space<vmem>>, %arg4: memref<26x32xf32, #tpu.memory_space<vmem>>, %arg5: memref<64x4xf32, #tpu.memory_space<vmem>>, %arg6: memref<6x4xf32, #tpu.memory_space<vmem>>, %arg7: memref<2x4xf32, #tpu.memory_space<vmem>>) attributes {dimension_semantics = [#tpu.dimension_semantics<arbitrary>], iteration_bounds = array<i64: 1>, scalar_prefetch = 0 : i64, scratch_operands = 0 : i64, tpu.core_type = #tpu.core_type<tc>, window_params = [{pipeline_mode = #tpu.pipeline_mode<synchronous>, transform_indices = @transform_0, window_bounds = array<i64: 32, 32>}, {pipeline_mode = #tpu.pipeline_mode<synchronous>, transform_indices = @transform_1, window_bounds = array<i64: 9, 96, 32>}, {pipeline_mode = #tpu.pipeline_mode<synchronous>, transform_indices = @transform_2, window_bounds = array<i64: 32, 32>}, {pipeline_mode = #tpu.pipeline_mode<synchronous>, transform_indices = @transform_3, window_bounds = array<i64: 26, 32>}, {pipeline_mode = #tpu.pipeline_mode<synchronous>, transform_indices = @transform_4, window_bounds = array<i64: 64, 4>}, {pipeline_mode = #tpu.pipeline_mode<synchronous>, transform_indices = @transform_5, window_bounds = array<i64: 6, 4>}, {pipeline_mode = #tpu.pipeline_mode<synchronous>, transform_indices = @transform_6, window_bounds = array<i64: 2, 4>}]} {
    %0 = tpu.iota {dimensions = array<i32: 0>} : vector<32x32xi32>
    %c15_i32 = arith.constant 15 : i32
    %1 = vector.broadcast %c15_i32 : i32 to vector<32x32xi32>
    %2 = arith.andi %0, %1 : vector<32x32xi32>
    %c0_i32 = arith.constant 0 : i32
    %3 = vector.broadcast %c0_i32 : i32 to vector<32x32xi32>
    %4 = arith.cmpi sgt, %2, %3 : vector<32x32xi32>
    %c15_i32_0 = arith.constant 15 : i32
    %5 = vector.broadcast %c15_i32_0 : i32 to vector<32x32xi32>
    %6 = arith.cmpi slt, %2, %5 : vector<32x32xi32>
    %c0 = arith.constant 0 : index
    %c0_1 = arith.constant 0 : index
    %7 = vector.load %arg1[%c0, %c0_1] : memref<32x32xf32, #tpu.memory_space<vmem>>, vector<32x32xf32>
    %c1_i32 = arith.constant 1 : i32
    %8 = tpu.dynamic_rotate %7 by %c1_i32 dim 0 : vector<32x32xf32>, i32 -> vector<32x32xf32>
    %cst = arith.constant 0.000000e+00 : f32
    %9 = vector.broadcast %cst : f32 to vector<32x32xf32>
    %10 = arith.select %4, %8, %9 : vector<32x32xi1>, vector<32x32xf32>
    %c31_i32 = arith.constant 31 : i32
    %11 = tpu.dynamic_rotate %7 by %c31_i32 dim 0 : vector<32x32xf32>, i32 -> vector<32x32xf32>
    %cst_2 = arith.constant 0.000000e+00 : f32
    %12 = vector.broadcast %cst_2 : f32 to vector<32x32xf32>
    %13 = arith.select %6, %11, %12 : vector<32x32xi1>, vector<32x32xf32>
    %14 = tpu.concatenate %10, %7, %13 in 1 : vector<32x32xf32>, vector<32x32xf32>, vector<32x32xf32> -> vector<32x96xf32>
    %c0_3 = arith.constant 0 : index
    %c0_4 = arith.constant 0 : index
    %c0_5 = arith.constant 0 : index
    %15 = vector.load %arg2[%c0_3, %c0_4, %c0_5] : memref<9x96x32xf32, #tpu.memory_space<vmem>>, vector<1x96x32xf32>
    %16 = vector.shape_cast %15 : vector<1x96x32xf32> to vector<96x32xf32>
    %cst_6 = arith.constant dense<0.000000e+00> : vector<32x32xf32>
    %17 = tpu.matmul %14, %16, %cst_6 {dimension_numbers = #tpu.dot_dimension_numbers<[1], [0], [0], [1], [0, 0, 1, 1], [], []>} : vector<32x96xf32>, vector<96x32xf32>, vector<32x32xf32> -> vector<32x32xf32>
    %c0_7 = arith.constant 0 : index
    %c0_8 = arith.constant 0 : index
    %18 = vector.load %arg4[%c0_7, %c0_8] : memref<26x32xf32, #tpu.memory_space<vmem>>, vector<1x32xf32>
    %19 = vector.broadcast %18 : vector<1x32xf32> to vector<32x32xf32>
    %20 = arith.addf %17, %19 : vector<32x32xf32>
    %cst_9 = arith.constant 0.000000e+00 : f32
    %21 = vector.broadcast %cst_9 : f32 to vector<32x32xf32>
    %22 = arith.maximumf %20, %21 : vector<32x32xf32>
    %c1 = arith.constant 1 : index
    %c0_10 = arith.constant 0 : index
    %23 = vector.load %arg4[%c1, %c0_10] : memref<26x32xf32, #tpu.memory_space<vmem>>, vector<1x32xf32>
    %24 = vector.broadcast %23 : vector<1x32xf32> to vector<32x32xf32>
    %25 = arith.mulf %22, %24 : vector<32x32xf32>
    %c2 = arith.constant 2 : index
    %c0_11 = arith.constant 0 : index
    %26 = vector.load %arg4[%c2, %c0_11] : memref<26x32xf32, #tpu.memory_space<vmem>>, vector<1x32xf32>
    %27 = vector.broadcast %26 : vector<1x32xf32> to vector<32x32xf32>
    %28 = arith.addf %25, %27 : vector<32x32xf32>
    %cst_12 = arith.constant 0.000000e+00 : f32
    %29 = vector.broadcast %cst_12 : f32 to vector<32x32xf32>
    %30 = arith.maximumf %28, %29 : vector<32x32xf32>
    %c1_i32_13 = arith.constant 1 : i32
    %31 = tpu.dynamic_rotate %30 by %c1_i32_13 dim 0 : vector<32x32xf32>, i32 -> vector<32x32xf32>
    %cst_14 = arith.constant 0.000000e+00 : f32
    %32 = vector.broadcast %cst_14 : f32 to vector<32x32xf32>
    %33 = arith.select %4, %31, %32 : vector<32x32xi1>, vector<32x32xf32>
    %c31_i32_15 = arith.constant 31 : i32
    %34 = tpu.dynamic_rotate %30 by %c31_i32_15 dim 0 : vector<32x32xf32>, i32 -> vector<32x32xf32>
    %cst_16 = arith.constant 0.000000e+00 : f32
    %35 = vector.broadcast %cst_16 : f32 to vector<32x32xf32>
    %36 = arith.select %6, %34, %35 : vector<32x32xi1>, vector<32x32xf32>
    %37 = tpu.concatenate %33, %30, %36 in 1 : vector<32x32xf32>, vector<32x32xf32>, vector<32x32xf32> -> vector<32x96xf32>
    %c1_17 = arith.constant 1 : index
    %c0_18 = arith.constant 0 : index
    %c0_19 = arith.constant 0 : index
    %38 = vector.load %arg2[%c1_17, %c0_18, %c0_19] : memref<9x96x32xf32, #tpu.memory_space<vmem>>, vector<1x96x32xf32>
    %39 = vector.shape_cast %38 : vector<1x96x32xf32> to vector<96x32xf32>
    %cst_20 = arith.constant dense<0.000000e+00> : vector<32x32xf32>
    %40 = tpu.matmul %37, %39, %cst_20 {dimension_numbers = #tpu.dot_dimension_numbers<[1], [0], [0], [1], [0, 0, 1, 1], [], []>} : vector<32x96xf32>, vector<96x32xf32>, vector<32x32xf32> -> vector<32x32xf32>
    %c3 = arith.constant 3 : index
    %c0_21 = arith.constant 0 : index
    %41 = vector.load %arg4[%c3, %c0_21] : memref<26x32xf32, #tpu.memory_space<vmem>>, vector<1x32xf32>
    %42 = vector.broadcast %41 : vector<1x32xf32> to vector<32x32xf32>
    %43 = arith.addf %40, %42 : vector<32x32xf32>
    %c4 = arith.constant 4 : index
    %c0_22 = arith.constant 0 : index
    %44 = vector.load %arg4[%c4, %c0_22] : memref<26x32xf32, #tpu.memory_space<vmem>>, vector<1x32xf32>
    %45 = vector.broadcast %44 : vector<1x32xf32> to vector<32x32xf32>
    %46 = arith.mulf %43, %45 : vector<32x32xf32>
    %c5 = arith.constant 5 : index
    %c0_23 = arith.constant 0 : index
    %47 = vector.load %arg4[%c5, %c0_23] : memref<26x32xf32, #tpu.memory_space<vmem>>, vector<1x32xf32>
    %48 = vector.broadcast %47 : vector<1x32xf32> to vector<32x32xf32>
    %49 = arith.addf %46, %48 : vector<32x32xf32>
    %cst_24 = arith.constant 0.000000e+00 : f32
    %50 = vector.broadcast %cst_24 : f32 to vector<32x32xf32>
    %51 = arith.maximumf %49, %50 : vector<32x32xf32>
    %c1_i32_25 = arith.constant 1 : i32
    %52 = tpu.dynamic_rotate %51 by %c1_i32_25 dim 0 : vector<32x32xf32>, i32 -> vector<32x32xf32>
    %cst_26 = arith.constant 0.000000e+00 : f32
    %53 = vector.broadcast %cst_26 : f32 to vector<32x32xf32>
    %54 = arith.select %4, %52, %53 : vector<32x32xi1>, vector<32x32xf32>
    %c31_i32_27 = arith.constant 31 : i32
    %55 = tpu.dynamic_rotate %51 by %c31_i32_27 dim 0 : vector<32x32xf32>, i32 -> vector<32x32xf32>
    %cst_28 = arith.constant 0.000000e+00 : f32
    %56 = vector.broadcast %cst_28 : f32 to vector<32x32xf32>
    %57 = arith.select %6, %55, %56 : vector<32x32xi1>, vector<32x32xf32>
    %58 = tpu.concatenate %54, %51, %57 in 1 : vector<32x32xf32>, vector<32x32xf32>, vector<32x32xf32> -> vector<32x96xf32>
    %c2_29 = arith.constant 2 : index
    %c0_30 = arith.constant 0 : index
    %c0_31 = arith.constant 0 : index
    %59 = vector.load %arg2[%c2_29, %c0_30, %c0_31] : memref<9x96x32xf32, #tpu.memory_space<vmem>>, vector<1x96x32xf32>
    %60 = vector.shape_cast %59 : vector<1x96x32xf32> to vector<96x32xf32>
    %cst_32 = arith.constant dense<0.000000e+00> : vector<32x32xf32>
    %61 = tpu.matmul %58, %60, %cst_32 {dimension_numbers = #tpu.dot_dimension_numbers<[1], [0], [0], [1], [0, 0, 1, 1], [], []>} : vector<32x96xf32>, vector<96x32xf32>, vector<32x32xf32> -> vector<32x32xf32>
    %c6 = arith.constant 6 : index
    %c0_33 = arith.constant 0 : index
    %62 = vector.load %arg4[%c6, %c0_33] : memref<26x32xf32, #tpu.memory_space<vmem>>, vector<1x32xf32>
    %63 = vector.broadcast %62 : vector<1x32xf32> to vector<32x32xf32>
    %64 = arith.addf %61, %63 : vector<32x32xf32>
    %c0_34 = arith.constant 0 : index
    %c0_35 = arith.constant 0 : index
    %65 = vector.load %arg3[%c0_34, %c0_35] : memref<32x32xf32, #tpu.memory_space<vmem>>, vector<32x32xf32>
    %cst_36 = arith.constant dense<0.000000e+00> : vector<32x32xf32>
    %66 = tpu.matmul %22, %65, %cst_36 {dimension_numbers = #tpu.dot_dimension_numbers<[1], [0], [0], [1], [0, 0, 1, 1], [], []>} : vector<32x32xf32>, vector<32x32xf32>, vector<32x32xf32> -> vector<32x32xf32>
    %c7 = arith.constant 7 : index
    %c0_37 = arith.constant 0 : index
    %67 = vector.load %arg4[%c7, %c0_37] : memref<26x32xf32, #tpu.memory_space<vmem>>, vector<1x32xf32>
    %68 = vector.broadcast %67 : vector<1x32xf32> to vector<32x32xf32>
    %69 = arith.addf %66, %68 : vector<32x32xf32>
    %70 = arith.addf %69, %64 : vector<32x32xf32>
    %71 = tpu.iota {dimensions = array<i32: 0>} : vector<32x32xi32>
    %c15_i32_38 = arith.constant 15 : i32
    %72 = vector.broadcast %c15_i32_38 : i32 to vector<32x32xi32>
    %73 = arith.andi %71, %72 : vector<32x32xi32>
    %c15_i32_39 = arith.constant 15 : i32
    %74 = vector.broadcast %c15_i32_39 : i32 to vector<32x32xi32>
    %75 = arith.cmpi slt, %73, %74 : vector<32x32xi32>
    %c31_i32_40 = arith.constant 31 : i32
    %76 = tpu.dynamic_rotate %70 by %c31_i32_40 dim 0 : vector<32x32xf32>, i32 -> vector<32x32xf32>
    %cst_41 = arith.constant 0.000000e+00 : f32
    %77 = vector.broadcast %cst_41 : f32 to vector<32x32xf32>
    %78 = arith.select %75, %76, %77 : vector<32x32xi1>, vector<32x32xf32>
    %c14_i32 = arith.constant 14 : i32
    %79 = vector.broadcast %c14_i32 : i32 to vector<32x32xi32>
    %80 = arith.cmpi slt, %73, %79 : vector<32x32xi32>
    %c30_i32 = arith.constant 30 : i32
    %81 = tpu.dynamic_rotate %70 by %c30_i32 dim 0 : vector<32x32xf32>, i32 -> vector<32x32xf32>
    %cst_42 = arith.constant 0.000000e+00 : f32
    %82 = vector.broadcast %cst_42 : f32 to vector<32x32xf32>
    %83 = arith.select %80, %81, %82 : vector<32x32xi1>, vector<32x32xf32>
    %84 = arith.maximumf %70, %78 : vector<32x32xf32>
    %85 = arith.maximumf %84, %83 : vector<32x32xf32>
    %86 = tpu.iota {dimensions = array<i32: 0>} : vector<16x32xi32>
    %87 = tpu.iota {dimensions = array<i32: 1>} : vector<16x32xi32>
    %c2_i32 = arith.constant 2 : i32
    %88 = vector.broadcast %c2_i32 : i32 to vector<16x32xi32>
    %89 = arith.muli %88, %86 : vector<16x32xi32>
    %90 = arith.cmpi eq, %87, %89 : vector<16x32xi32>
    %91 = arith.extui %90 : vector<16x32xi1> to vector<16x32xi32>
    %92 = arith.sitofp %91 : vector<16x32xi32> to vector<16x32xf32>
    %cst_43 = arith.constant dense<0.000000e+00> : vector<16x32xf32>
    %93 = tpu.matmul %92, %85, %cst_43 {dimension_numbers = #tpu.dot_dimension_numbers<[1], [0], [0], [1], [0, 0, 1, 1], [], []>} : vector<16x32xf32>, vector<32x32xf32>, vector<16x32xf32> -> vector<16x32xf32>
    %94 = tpu.iota {dimensions = array<i32: 0>} : vector<16x32xi32>
    %c7_i32 = arith.constant 7 : i32
    %95 = vector.broadcast %c7_i32 : i32 to vector<16x32xi32>
    %96 = arith.andi %94, %95 : vector<16x32xi32>
    %c0_i32_44 = arith.constant 0 : i32
    %97 = vector.broadcast %c0_i32_44 : i32 to vector<16x32xi32>
    %98 = arith.cmpi sgt, %96, %97 : vector<16x32xi32>
    %c7_i32_45 = arith.constant 7 : i32
    %99 = vector.broadcast %c7_i32_45 : i32 to vector<16x32xi32>
    %100 = arith.cmpi slt, %96, %99 : vector<16x32xi32>
    %c8 = arith.constant 8 : index
    %c0_46 = arith.constant 0 : index
    %101 = vector.load %arg4[%c8, %c0_46] : memref<26x32xf32, #tpu.memory_space<vmem>>, vector<1x32xf32>
    %102 = vector.broadcast %101 : vector<1x32xf32> to vector<16x32xf32>
    %103 = arith.mulf %93, %102 : vector<16x32xf32>
    %c9 = arith.constant 9 : index
    %c0_47 = arith.constant 0 : index
    %104 = vector.load %arg4[%c9, %c0_47] : memref<26x32xf32, #tpu.memory_space<vmem>>, vector<1x32xf32>
    %105 = vector.broadcast %104 : vector<1x32xf32> to vector<16x32xf32>
    %106 = arith.addf %103, %105 : vector<16x32xf32>
    %cst_48 = arith.constant 0.000000e+00 : f32
    %107 = vector.broadcast %cst_48 : f32 to vector<16x32xf32>
    %108 = arith.maximumf %106, %107 : vector<16x32xf32>
    %c1_i32_49 = arith.constant 1 : i32
    %109 = tpu.dynamic_rotate %108 by %c1_i32_49 dim 0 : vector<16x32xf32>, i32 -> vector<16x32xf32>
    %cst_50 = arith.constant 0.000000e+00 : f32
    %110 = vector.broadcast %cst_50 : f32 to vector<16x32xf32>
    %111 = arith.select %98, %109, %110 : vector<16x32xi1>, vector<16x32xf32>
    %c15_i32_51 = arith.constant 15 : i32
    %112 = tpu.dynamic_rotate %108 by %c15_i32_51 dim 0 : vector<16x32xf32>, i32 -> vector<16x32xf32>
    %cst_52 = arith.constant 0.000000e+00 : f32
    %113 = vector.broadcast %cst_52 : f32 to vector<16x32xf32>
    %114 = arith.select %100, %112, %113 : vector<16x32xi1>, vector<16x32xf32>
    %115 = tpu.concatenate %111, %108, %114 in 1 : vector<16x32xf32>, vector<16x32xf32>, vector<16x32xf32> -> vector<16x96xf32>
    %c3_53 = arith.constant 3 : index
    %c0_54 = arith.constant 0 : index
    %c0_55 = arith.constant 0 : index
    %116 = vector.load %arg2[%c3_53, %c0_54, %c0_55] : memref<9x96x32xf32, #tpu.memory_space<vmem>>, vector<1x96x32xf32>
    %117 = vector.shape_cast %116 : vector<1x96x32xf32> to vector<96x32xf32>
    %cst_56 = arith.constant dense<0.000000e+00> : vector<16x32xf32>
    %118 = tpu.matmul %115, %117, %cst_56 {dimension_numbers = #tpu.dot_dimension_numbers<[1], [0], [0], [1], [0, 0, 1, 1], [], []>} : vector<16x96xf32>, vector<96x32xf32>, vector<16x32xf32> -> vector<16x32xf32>
    %c10 = arith.constant 10 : index
    %c0_57 = arith.constant 0 : index
    %119 = vector.load %arg4[%c10, %c0_57] : memref<26x32xf32, #tpu.memory_space<vmem>>, vector<1x32xf32>
    %120 = vector.broadcast %119 : vector<1x32xf32> to vector<16x32xf32>
    %121 = arith.addf %118, %120 : vector<16x32xf32>
    %c11 = arith.constant 11 : index
    %c0_58 = arith.constant 0 : index
    %122 = vector.load %arg4[%c11, %c0_58] : memref<26x32xf32, #tpu.memory_space<vmem>>, vector<1x32xf32>
    %123 = vector.broadcast %122 : vector<1x32xf32> to vector<16x32xf32>
    %124 = arith.mulf %121, %123 : vector<16x32xf32>
    %c12 = arith.constant 12 : index
    %c0_59 = arith.constant 0 : index
    %125 = vector.load %arg4[%c12, %c0_59] : memref<26x32xf32, #tpu.memory_space<vmem>>, vector<1x32xf32>
    %126 = vector.broadcast %125 : vector<1x32xf32> to vector<16x32xf32>
    %127 = arith.addf %124, %126 : vector<16x32xf32>
    %cst_60 = arith.constant 0.000000e+00 : f32
    %128 = vector.broadcast %cst_60 : f32 to vector<16x32xf32>
    %129 = arith.maximumf %127, %128 : vector<16x32xf32>
    %c1_i32_61 = arith.constant 1 : i32
    %130 = tpu.dynamic_rotate %129 by %c1_i32_61 dim 0 : vector<16x32xf32>, i32 -> vector<16x32xf32>
    %cst_62 = arith.constant 0.000000e+00 : f32
    %131 = vector.broadcast %cst_62 : f32 to vector<16x32xf32>
    %132 = arith.select %98, %130, %131 : vector<16x32xi1>, vector<16x32xf32>
    %c15_i32_63 = arith.constant 15 : i32
    %133 = tpu.dynamic_rotate %129 by %c15_i32_63 dim 0 : vector<16x32xf32>, i32 -> vector<16x32xf32>
    %cst_64 = arith.constant 0.000000e+00 : f32
    %134 = vector.broadcast %cst_64 : f32 to vector<16x32xf32>
    %135 = arith.select %100, %133, %134 : vector<16x32xi1>, vector<16x32xf32>
    %136 = tpu.concatenate %132, %129, %135 in 1 : vector<16x32xf32>, vector<16x32xf32>, vector<16x32xf32> -> vector<16x96xf32>
    %c4_65 = arith.constant 4 : index
    %c0_66 = arith.constant 0 : index
    %c0_67 = arith.constant 0 : index
    %137 = vector.load %arg2[%c4_65, %c0_66, %c0_67] : memref<9x96x32xf32, #tpu.memory_space<vmem>>, vector<1x96x32xf32>
    %138 = vector.shape_cast %137 : vector<1x96x32xf32> to vector<96x32xf32>
    %cst_68 = arith.constant dense<0.000000e+00> : vector<16x32xf32>
    %139 = tpu.matmul %136, %138, %cst_68 {dimension_numbers = #tpu.dot_dimension_numbers<[1], [0], [0], [1], [0, 0, 1, 1], [], []>} : vector<16x96xf32>, vector<96x32xf32>, vector<16x32xf32> -> vector<16x32xf32>
    %c13 = arith.constant 13 : index
    %c0_69 = arith.constant 0 : index
    %140 = vector.load %arg4[%c13, %c0_69] : memref<26x32xf32, #tpu.memory_space<vmem>>, vector<1x32xf32>
    %141 = vector.broadcast %140 : vector<1x32xf32> to vector<16x32xf32>
    %142 = arith.addf %139, %141 : vector<16x32xf32>
    %143 = arith.addf %142, %93 : vector<16x32xf32>
    %144 = tpu.iota {dimensions = array<i32: 0>} : vector<16x32xi32>
    %c7_i32_70 = arith.constant 7 : i32
    %145 = vector.broadcast %c7_i32_70 : i32 to vector<16x32xi32>
    %146 = arith.andi %144, %145 : vector<16x32xi32>
    %c7_i32_71 = arith.constant 7 : i32
    %147 = vector.broadcast %c7_i32_71 : i32 to vector<16x32xi32>
    %148 = arith.cmpi slt, %146, %147 : vector<16x32xi32>
    %c15_i32_72 = arith.constant 15 : i32
    %149 = tpu.dynamic_rotate %143 by %c15_i32_72 dim 0 : vector<16x32xf32>, i32 -> vector<16x32xf32>
    %cst_73 = arith.constant 0.000000e+00 : f32
    %150 = vector.broadcast %cst_73 : f32 to vector<16x32xf32>
    %151 = arith.select %148, %149, %150 : vector<16x32xi1>, vector<16x32xf32>
    %c6_i32 = arith.constant 6 : i32
    %152 = vector.broadcast %c6_i32 : i32 to vector<16x32xi32>
    %153 = arith.cmpi slt, %146, %152 : vector<16x32xi32>
    %c14_i32_74 = arith.constant 14 : i32
    %154 = tpu.dynamic_rotate %143 by %c14_i32_74 dim 0 : vector<16x32xf32>, i32 -> vector<16x32xf32>
    %cst_75 = arith.constant 0.000000e+00 : f32
    %155 = vector.broadcast %cst_75 : f32 to vector<16x32xf32>
    %156 = arith.select %153, %154, %155 : vector<16x32xi1>, vector<16x32xf32>
    %157 = arith.maximumf %143, %151 : vector<16x32xf32>
    %158 = arith.maximumf %157, %156 : vector<16x32xf32>
    %159 = tpu.iota {dimensions = array<i32: 0>} : vector<8x16xi32>
    %160 = tpu.iota {dimensions = array<i32: 1>} : vector<8x16xi32>
    %c2_i32_76 = arith.constant 2 : i32
    %161 = vector.broadcast %c2_i32_76 : i32 to vector<8x16xi32>
    %162 = arith.muli %161, %159 : vector<8x16xi32>
    %163 = arith.cmpi eq, %160, %162 : vector<8x16xi32>
    %164 = arith.extui %163 : vector<8x16xi1> to vector<8x16xi32>
    %165 = arith.sitofp %164 : vector<8x16xi32> to vector<8x16xf32>
    %cst_77 = arith.constant dense<0.000000e+00> : vector<8x32xf32>
    %166 = tpu.matmul %165, %158, %cst_77 {dimension_numbers = #tpu.dot_dimension_numbers<[1], [0], [0], [1], [0, 0, 1, 1], [], []>} : vector<8x16xf32>, vector<16x32xf32>, vector<8x32xf32> -> vector<8x32xf32>
    %167 = tpu.iota {dimensions = array<i32: 0>} : vector<8x32xi32>
    %c3_i32 = arith.constant 3 : i32
    %168 = vector.broadcast %c3_i32 : i32 to vector<8x32xi32>
    %169 = arith.andi %167, %168 : vector<8x32xi32>
    %c0_i32_78 = arith.constant 0 : i32
    %170 = vector.broadcast %c0_i32_78 : i32 to vector<8x32xi32>
    %171 = arith.cmpi sgt, %169, %170 : vector<8x32xi32>
    %c3_i32_79 = arith.constant 3 : i32
    %172 = vector.broadcast %c3_i32_79 : i32 to vector<8x32xi32>
    %173 = arith.cmpi slt, %169, %172 : vector<8x32xi32>
    %c14 = arith.constant 14 : index
    %c0_80 = arith.constant 0 : index
    %174 = vector.load %arg4[%c14, %c0_80] : memref<26x32xf32, #tpu.memory_space<vmem>>, vector<1x32xf32>
    %175 = vector.broadcast %174 : vector<1x32xf32> to vector<8x32xf32>
    %176 = arith.mulf %166, %175 : vector<8x32xf32>
    %c15 = arith.constant 15 : index
    %c0_81 = arith.constant 0 : index
    %177 = vector.load %arg4[%c15, %c0_81] : memref<26x32xf32, #tpu.memory_space<vmem>>, vector<1x32xf32>
    %178 = vector.broadcast %177 : vector<1x32xf32> to vector<8x32xf32>
    %179 = arith.addf %176, %178 : vector<8x32xf32>
    %cst_82 = arith.constant 0.000000e+00 : f32
    %180 = vector.broadcast %cst_82 : f32 to vector<8x32xf32>
    %181 = arith.maximumf %179, %180 : vector<8x32xf32>
    %c1_i32_83 = arith.constant 1 : i32
    %182 = tpu.dynamic_rotate %181 by %c1_i32_83 dim 0 : vector<8x32xf32>, i32 -> vector<8x32xf32>
    %cst_84 = arith.constant 0.000000e+00 : f32
    %183 = vector.broadcast %cst_84 : f32 to vector<8x32xf32>
    %184 = arith.select %171, %182, %183 : vector<8x32xi1>, vector<8x32xf32>
    %c7_i32_85 = arith.constant 7 : i32
    %185 = tpu.dynamic_rotate %181 by %c7_i32_85 dim 0 : vector<8x32xf32>, i32 -> vector<8x32xf32>
    %cst_86 = arith.constant 0.000000e+00 : f32
    %186 = vector.broadcast %cst_86 : f32 to vector<8x32xf32>
    %187 = arith.select %173, %185, %186 : vector<8x32xi1>, vector<8x32xf32>
    %188 = tpu.concatenate %184, %181, %187 in 1 : vector<8x32xf32>, vector<8x32xf32>, vector<8x32xf32> -> vector<8x96xf32>
    %c5_87 = arith.constant 5 : index
    %c0_88 = arith.constant 0 : index
    %c0_89 = arith.constant 0 : index
    %189 = vector.load %arg2[%c5_87, %c0_88, %c0_89] : memref<9x96x32xf32, #tpu.memory_space<vmem>>, vector<1x96x32xf32>
    %190 = vector.shape_cast %189 : vector<1x96x32xf32> to vector<96x32xf32>
    %cst_90 = arith.constant dense<0.000000e+00> : vector<8x32xf32>
    %191 = tpu.matmul %188, %190, %cst_90 {dimension_numbers = #tpu.dot_dimension_numbers<[1], [0], [0], [1], [0, 0, 1, 1], [], []>} : vector<8x96xf32>, vector<96x32xf32>, vector<8x32xf32> -> vector<8x32xf32>
    %c16 = arith.constant 16 : index
    %c0_91 = arith.constant 0 : index
    %192 = vector.load %arg4[%c16, %c0_91] : memref<26x32xf32, #tpu.memory_space<vmem>>, vector<1x32xf32>
    %193 = vector.broadcast %192 : vector<1x32xf32> to vector<8x32xf32>
    %194 = arith.addf %191, %193 : vector<8x32xf32>
    %c17 = arith.constant 17 : index
    %c0_92 = arith.constant 0 : index
    %195 = vector.load %arg4[%c17, %c0_92] : memref<26x32xf32, #tpu.memory_space<vmem>>, vector<1x32xf32>
    %196 = vector.broadcast %195 : vector<1x32xf32> to vector<8x32xf32>
    %197 = arith.mulf %194, %196 : vector<8x32xf32>
    %c18 = arith.constant 18 : index
    %c0_93 = arith.constant 0 : index
    %198 = vector.load %arg4[%c18, %c0_93] : memref<26x32xf32, #tpu.memory_space<vmem>>, vector<1x32xf32>
    %199 = vector.broadcast %198 : vector<1x32xf32> to vector<8x32xf32>
    %200 = arith.addf %197, %199 : vector<8x32xf32>
    %cst_94 = arith.constant 0.000000e+00 : f32
    %201 = vector.broadcast %cst_94 : f32 to vector<8x32xf32>
    %202 = arith.maximumf %200, %201 : vector<8x32xf32>
    %c1_i32_95 = arith.constant 1 : i32
    %203 = tpu.dynamic_rotate %202 by %c1_i32_95 dim 0 : vector<8x32xf32>, i32 -> vector<8x32xf32>
    %cst_96 = arith.constant 0.000000e+00 : f32
    %204 = vector.broadcast %cst_96 : f32 to vector<8x32xf32>
    %205 = arith.select %171, %203, %204 : vector<8x32xi1>, vector<8x32xf32>
    %c7_i32_97 = arith.constant 7 : i32
    %206 = tpu.dynamic_rotate %202 by %c7_i32_97 dim 0 : vector<8x32xf32>, i32 -> vector<8x32xf32>
    %cst_98 = arith.constant 0.000000e+00 : f32
    %207 = vector.broadcast %cst_98 : f32 to vector<8x32xf32>
    %208 = arith.select %173, %206, %207 : vector<8x32xi1>, vector<8x32xf32>
    %209 = tpu.concatenate %205, %202, %208 in 1 : vector<8x32xf32>, vector<8x32xf32>, vector<8x32xf32> -> vector<8x96xf32>
    %c6_99 = arith.constant 6 : index
    %c0_100 = arith.constant 0 : index
    %c0_101 = arith.constant 0 : index
    %210 = vector.load %arg2[%c6_99, %c0_100, %c0_101] : memref<9x96x32xf32, #tpu.memory_space<vmem>>, vector<1x96x32xf32>
    %211 = vector.shape_cast %210 : vector<1x96x32xf32> to vector<96x32xf32>
    %cst_102 = arith.constant dense<0.000000e+00> : vector<8x32xf32>
    %212 = tpu.matmul %209, %211, %cst_102 {dimension_numbers = #tpu.dot_dimension_numbers<[1], [0], [0], [1], [0, 0, 1, 1], [], []>} : vector<8x96xf32>, vector<96x32xf32>, vector<8x32xf32> -> vector<8x32xf32>
    %c19 = arith.constant 19 : index
    %c0_103 = arith.constant 0 : index
    %213 = vector.load %arg4[%c19, %c0_103] : memref<26x32xf32, #tpu.memory_space<vmem>>, vector<1x32xf32>
    %214 = vector.broadcast %213 : vector<1x32xf32> to vector<8x32xf32>
    %215 = arith.addf %212, %214 : vector<8x32xf32>
    %216 = arith.addf %215, %166 : vector<8x32xf32>
    %217 = tpu.iota {dimensions = array<i32: 0>} : vector<8x32xi32>
    %c3_i32_104 = arith.constant 3 : i32
    %218 = vector.broadcast %c3_i32_104 : i32 to vector<8x32xi32>
    %219 = arith.andi %217, %218 : vector<8x32xi32>
    %c3_i32_105 = arith.constant 3 : i32
    %220 = vector.broadcast %c3_i32_105 : i32 to vector<8x32xi32>
    %221 = arith.cmpi slt, %219, %220 : vector<8x32xi32>
    %c7_i32_106 = arith.constant 7 : i32
    %222 = tpu.dynamic_rotate %216 by %c7_i32_106 dim 0 : vector<8x32xf32>, i32 -> vector<8x32xf32>
    %cst_107 = arith.constant 0.000000e+00 : f32
    %223 = vector.broadcast %cst_107 : f32 to vector<8x32xf32>
    %224 = arith.select %221, %222, %223 : vector<8x32xi1>, vector<8x32xf32>
    %c2_i32_108 = arith.constant 2 : i32
    %225 = vector.broadcast %c2_i32_108 : i32 to vector<8x32xi32>
    %226 = arith.cmpi slt, %219, %225 : vector<8x32xi32>
    %c6_i32_109 = arith.constant 6 : i32
    %227 = tpu.dynamic_rotate %216 by %c6_i32_109 dim 0 : vector<8x32xf32>, i32 -> vector<8x32xf32>
    %cst_110 = arith.constant 0.000000e+00 : f32
    %228 = vector.broadcast %cst_110 : f32 to vector<8x32xf32>
    %229 = arith.select %226, %227, %228 : vector<8x32xi1>, vector<8x32xf32>
    %230 = arith.maximumf %216, %224 : vector<8x32xf32>
    %231 = arith.maximumf %230, %229 : vector<8x32xf32>
    %232 = tpu.iota {dimensions = array<i32: 0>} : vector<8x8xi32>
    %233 = tpu.iota {dimensions = array<i32: 1>} : vector<8x8xi32>
    %c2_i32_111 = arith.constant 2 : i32
    %234 = vector.broadcast %c2_i32_111 : i32 to vector<8x8xi32>
    %235 = arith.muli %234, %232 : vector<8x8xi32>
    %236 = arith.cmpi eq, %233, %235 : vector<8x8xi32>
    %237 = arith.extui %236 : vector<8x8xi1> to vector<8x8xi32>
    %238 = arith.sitofp %237 : vector<8x8xi32> to vector<8x8xf32>
    %cst_112 = arith.constant dense<0.000000e+00> : vector<8x32xf32>
    %239 = tpu.matmul %238, %231, %cst_112 {dimension_numbers = #tpu.dot_dimension_numbers<[1], [0], [0], [1], [0, 0, 1, 1], [], []>} : vector<8x8xf32>, vector<8x32xf32>, vector<8x32xf32> -> vector<8x32xf32>
    %240 = tpu.iota {dimensions = array<i32: 0>} : vector<8x32xi32>
    %c1_i32_113 = arith.constant 1 : i32
    %241 = vector.broadcast %c1_i32_113 : i32 to vector<8x32xi32>
    %242 = arith.andi %240, %241 : vector<8x32xi32>
    %c0_i32_114 = arith.constant 0 : i32
    %243 = vector.broadcast %c0_i32_114 : i32 to vector<8x32xi32>
    %244 = arith.cmpi sgt, %242, %243 : vector<8x32xi32>
    %c1_i32_115 = arith.constant 1 : i32
    %245 = vector.broadcast %c1_i32_115 : i32 to vector<8x32xi32>
    %246 = arith.cmpi slt, %242, %245 : vector<8x32xi32>
    %c20 = arith.constant 20 : index
    %c0_116 = arith.constant 0 : index
    %247 = vector.load %arg4[%c20, %c0_116] : memref<26x32xf32, #tpu.memory_space<vmem>>, vector<1x32xf32>
    %248 = vector.broadcast %247 : vector<1x32xf32> to vector<8x32xf32>
    %249 = arith.mulf %239, %248 : vector<8x32xf32>
    %c21 = arith.constant 21 : index
    %c0_117 = arith.constant 0 : index
    %250 = vector.load %arg4[%c21, %c0_117] : memref<26x32xf32, #tpu.memory_space<vmem>>, vector<1x32xf32>
    %251 = vector.broadcast %250 : vector<1x32xf32> to vector<8x32xf32>
    %252 = arith.addf %249, %251 : vector<8x32xf32>
    %cst_118 = arith.constant 0.000000e+00 : f32
    %253 = vector.broadcast %cst_118 : f32 to vector<8x32xf32>
    %254 = arith.maximumf %252, %253 : vector<8x32xf32>
    %c1_i32_119 = arith.constant 1 : i32
    %255 = tpu.dynamic_rotate %254 by %c1_i32_119 dim 0 : vector<8x32xf32>, i32 -> vector<8x32xf32>
    %cst_120 = arith.constant 0.000000e+00 : f32
    %256 = vector.broadcast %cst_120 : f32 to vector<8x32xf32>
    %257 = arith.select %244, %255, %256 : vector<8x32xi1>, vector<8x32xf32>
    %c7_i32_121 = arith.constant 7 : i32
    %258 = tpu.dynamic_rotate %254 by %c7_i32_121 dim 0 : vector<8x32xf32>, i32 -> vector<8x32xf32>
    %cst_122 = arith.constant 0.000000e+00 : f32
    %259 = vector.broadcast %cst_122 : f32 to vector<8x32xf32>
    %260 = arith.select %246, %258, %259 : vector<8x32xi1>, vector<8x32xf32>
    %261 = tpu.concatenate %257, %254, %260 in 1 : vector<8x32xf32>, vector<8x32xf32>, vector<8x32xf32> -> vector<8x96xf32>
    %c7_123 = arith.constant 7 : index
    %c0_124 = arith.constant 0 : index
    %c0_125 = arith.constant 0 : index
    %262 = vector.load %arg2[%c7_123, %c0_124, %c0_125] : memref<9x96x32xf32, #tpu.memory_space<vmem>>, vector<1x96x32xf32>
    %263 = vector.shape_cast %262 : vector<1x96x32xf32> to vector<96x32xf32>
    %cst_126 = arith.constant dense<0.000000e+00> : vector<8x32xf32>
    %264 = tpu.matmul %261, %263, %cst_126 {dimension_numbers = #tpu.dot_dimension_numbers<[1], [0], [0], [1], [0, 0, 1, 1], [], []>} : vector<8x96xf32>, vector<96x32xf32>, vector<8x32xf32> -> vector<8x32xf32>
    %c22 = arith.constant 22 : index
    %c0_127 = arith.constant 0 : index
    %265 = vector.load %arg4[%c22, %c0_127] : memref<26x32xf32, #tpu.memory_space<vmem>>, vector<1x32xf32>
    %266 = vector.broadcast %265 : vector<1x32xf32> to vector<8x32xf32>
    %267 = arith.addf %264, %266 : vector<8x32xf32>
    %c23 = arith.constant 23 : index
    %c0_128 = arith.constant 0 : index
    %268 = vector.load %arg4[%c23, %c0_128] : memref<26x32xf32, #tpu.memory_space<vmem>>, vector<1x32xf32>
    %269 = vector.broadcast %268 : vector<1x32xf32> to vector<8x32xf32>
    %270 = arith.mulf %267, %269 : vector<8x32xf32>
    %c24 = arith.constant 24 : index
    %c0_129 = arith.constant 0 : index
    %271 = vector.load %arg4[%c24, %c0_129] : memref<26x32xf32, #tpu.memory_space<vmem>>, vector<1x32xf32>
    %272 = vector.broadcast %271 : vector<1x32xf32> to vector<8x32xf32>
    %273 = arith.addf %270, %272 : vector<8x32xf32>
    %cst_130 = arith.constant 0.000000e+00 : f32
    %274 = vector.broadcast %cst_130 : f32 to vector<8x32xf32>
    %275 = arith.maximumf %273, %274 : vector<8x32xf32>
    %c1_i32_131 = arith.constant 1 : i32
    %276 = tpu.dynamic_rotate %275 by %c1_i32_131 dim 0 : vector<8x32xf32>, i32 -> vector<8x32xf32>
    %cst_132 = arith.constant 0.000000e+00 : f32
    %277 = vector.broadcast %cst_132 : f32 to vector<8x32xf32>
    %278 = arith.select %244, %276, %277 : vector<8x32xi1>, vector<8x32xf32>
    %c7_i32_133 = arith.constant 7 : i32
    %279 = tpu.dynamic_rotate %275 by %c7_i32_133 dim 0 : vector<8x32xf32>, i32 -> vector<8x32xf32>
    %cst_134 = arith.constant 0.000000e+00 : f32
    %280 = vector.broadcast %cst_134 : f32 to vector<8x32xf32>
    %281 = arith.select %246, %279, %280 : vector<8x32xi1>, vector<8x32xf32>
    %282 = tpu.concatenate %278, %275, %281 in 1 : vector<8x32xf32>, vector<8x32xf32>, vector<8x32xf32> -> vector<8x96xf32>
    %c8_135 = arith.constant 8 : index
    %c0_136 = arith.constant 0 : index
    %c0_137 = arith.constant 0 : index
    %283 = vector.load %arg2[%c8_135, %c0_136, %c0_137] : memref<9x96x32xf32, #tpu.memory_space<vmem>>, vector<1x96x32xf32>
    %284 = vector.shape_cast %283 : vector<1x96x32xf32> to vector<96x32xf32>
    %cst_138 = arith.constant dense<0.000000e+00> : vector<8x32xf32>
    %285 = tpu.matmul %282, %284, %cst_138 {dimension_numbers = #tpu.dot_dimension_numbers<[1], [0], [0], [1], [0, 0, 1, 1], [], []>} : vector<8x96xf32>, vector<96x32xf32>, vector<8x32xf32> -> vector<8x32xf32>
    %c25 = arith.constant 25 : index
    %c0_139 = arith.constant 0 : index
    %286 = vector.load %arg4[%c25, %c0_139] : memref<26x32xf32, #tpu.memory_space<vmem>>, vector<1x32xf32>
    %287 = vector.broadcast %286 : vector<1x32xf32> to vector<8x32xf32>
    %288 = arith.addf %285, %287 : vector<8x32xf32>
    %289 = arith.addf %288, %239 : vector<8x32xf32>
    %c0_140 = arith.constant 0 : index
    %c0_141 = arith.constant 0 : index
    %290 = vector.load %arg5[%c0_140, %c0_141] : memref<64x4xf32, #tpu.memory_space<vmem>>, vector<32x4xf32>
    %cst_142 = arith.constant dense<0.000000e+00> : vector<8x4xf32>
    %291 = tpu.matmul %289, %290, %cst_142 {dimension_numbers = #tpu.dot_dimension_numbers<[1], [0], [0], [1], [0, 0, 1, 1], [], []>} : vector<8x32xf32>, vector<32x4xf32>, vector<8x4xf32> -> vector<8x4xf32>
    %c7_i32_143 = arith.constant 7 : i32
    %292 = tpu.dynamic_rotate %289 by %c7_i32_143 dim 0 : vector<8x32xf32>, i32 -> vector<8x32xf32>
    %c32 = arith.constant 32 : index
    %c0_144 = arith.constant 0 : index
    %293 = vector.load %arg5[%c32, %c0_144] : memref<64x4xf32, #tpu.memory_space<vmem>>, vector<32x4xf32>
    %cst_145 = arith.constant dense<0.000000e+00> : vector<8x4xf32>
    %294 = tpu.matmul %292, %293, %cst_145 {dimension_numbers = #tpu.dot_dimension_numbers<[1], [0], [0], [1], [0, 0, 1, 1], [], []>} : vector<8x32xf32>, vector<32x4xf32>, vector<8x4xf32> -> vector<8x4xf32>
    %295 = arith.addf %291, %294 : vector<8x4xf32>
    %c0_146 = arith.constant 0 : index
    %c0_147 = arith.constant 0 : index
    %296 = vector.load %arg6[%c0_146, %c0_147] : memref<6x4xf32, #tpu.memory_space<vmem>>, vector<1x4xf32>
    %297 = vector.broadcast %296 : vector<1x4xf32> to vector<8x4xf32>
    %298 = arith.addf %295, %297 : vector<8x4xf32>
    %cst_148 = arith.constant 0.000000e+00 : f32
    %299 = vector.broadcast %cst_148 : f32 to vector<8x4xf32>
    %300 = arith.maximumf %298, %299 : vector<8x4xf32>
    %c1_149 = arith.constant 1 : index
    %c0_150 = arith.constant 0 : index
    %301 = vector.load %arg6[%c1_149, %c0_150] : memref<6x4xf32, #tpu.memory_space<vmem>>, vector<4x4xf32>
    %cst_151 = arith.constant dense<0.000000e+00> : vector<8x4xf32>
    %302 = tpu.matmul %300, %301, %cst_151 {dimension_numbers = #tpu.dot_dimension_numbers<[1], [0], [0], [1], [0, 0, 1, 1], [], []>} : vector<8x4xf32>, vector<4x4xf32>, vector<8x4xf32> -> vector<8x4xf32>
    %c5_152 = arith.constant 5 : index
    %c0_153 = arith.constant 0 : index
    %303 = vector.load %arg6[%c5_152, %c0_153] : memref<6x4xf32, #tpu.memory_space<vmem>>, vector<1x4xf32>
    %304 = vector.broadcast %303 : vector<1x4xf32> to vector<8x4xf32>
    %305 = arith.addf %302, %304 : vector<8x4xf32>
    %306 = vector.extract_strided_slice %305 {offsets = [0, 0], sizes = [1, 4], strides = [1, 1]} : vector<8x4xf32> to vector<1x4xf32>
    %c0_154 = arith.constant 0 : index
    %c0_155 = arith.constant 0 : index
    %307 = vector.load %arg7[%c0_154, %c0_155] : memref<2x4xf32, #tpu.memory_space<vmem>>, vector<1x4xf32>
    tpu.vector_store %arg7[%c0_154, %c0_155], %306 {strides = array<i32>} : memref<2x4xf32, #tpu.memory_space<vmem>>, vector<1x4xf32>,
    %308 = vector.extract_strided_slice %305 {offsets = [2, 0], sizes = [1, 4], strides = [1, 1]} : vector<8x4xf32> to vector<1x4xf32>
    %c1_156 = arith.constant 1 : index
    %c0_157 = arith.constant 0 : index
    %309 = vector.load %arg7[%c1_156, %c0_157] : memref<2x4xf32, #tpu.memory_space<vmem>>, vector<1x4xf32>
    tpu.vector_store %arg7[%c1_156, %c0_157], %308 {strides = array<i32>} : memref<2x4xf32, #tpu.memory_space<vmem>>, vector<1x4xf32>,
    return
  }
  func.func @transform_0(%arg0: i32) -> (i32, i32) {
    %c0_i32 = arith.constant 0 : i32
    %c0_i32_0 = arith.constant 0 : i32
    %c0_i32_1 = arith.constant 0 : i32
    return %c0_i32, %c0_i32_0 : i32, i32
  }
  func.func @transform_1(%arg0: i32) -> (i32, i32, i32) {
    %c0_i32 = arith.constant 0 : i32
    %c0_i32_0 = arith.constant 0 : i32
    %c0_i32_1 = arith.constant 0 : i32
    %c0_i32_2 = arith.constant 0 : i32
    return %c0_i32, %c0_i32_0, %c0_i32_1 : i32, i32, i32
  }
  func.func @transform_2(%arg0: i32) -> (i32, i32) {
    %c0_i32 = arith.constant 0 : i32
    %c0_i32_0 = arith.constant 0 : i32
    %c0_i32_1 = arith.constant 0 : i32
    return %c0_i32, %c0_i32_0 : i32, i32
  }
  func.func @transform_3(%arg0: i32) -> (i32, i32) {
    %c0_i32 = arith.constant 0 : i32
    %c0_i32_0 = arith.constant 0 : i32
    %c0_i32_1 = arith.constant 0 : i32
    return %c0_i32, %c0_i32_0 : i32, i32
  }
  func.func @transform_4(%arg0: i32) -> (i32, i32) {
    %c0_i32 = arith.constant 0 : i32
    %c0_i32_0 = arith.constant 0 : i32
    %c0_i32_1 = arith.constant 0 : i32
    return %c0_i32, %c0_i32_0 : i32, i32
  }
  func.func @transform_5(%arg0: i32) -> (i32, i32) {
    %c0_i32 = arith.constant 0 : i32
    %c0_i32_0 = arith.constant 0 : i32
    %c0_i32_1 = arith.constant 0 : i32
    return %c0_i32, %c0_i32_0 : i32, i32
  }
  func.func @transform_6(%arg0: i32) -> (i32, i32) {
    %c0_i32 = arith.constant 0 : i32
    %c0_i32_0 = arith.constant 0 : i32
    %c0_i32_1 = arith.constant 0 : i32
    return %c0_i32, %c0_i32_0 : i32, i32
  }
}

</mosaic_0001>

<bundles_post_ra>
// kernel: dpcnn_forward.1
= control target key start
LH: loop header
LB: loop body
LE: loop exit
PB: predicated region body
PF: predicated region fallthrough
CT: control target
= control target key end

     0   :  { %v24_v3 = vlaneseq  ;;  %s2987_s27 = smov 32   ;;  %s2988_s17 = smov 64   ;;  %s3943_s0 = inlined_call_operand.vmem [shape: f32[32,32], index: 0, kind: input, shape index: {}]   ;;  %s3944_s1 = inlined_call_operand.vmem [shape: f32[9,96,32], index: 1, kind: input, shape index: {}]   ;;  %s3945_s2 = inlined_call_operand.vmem [shape: f32[32,32], index: 2, kind: input, shape index: {}]   ;;  %s3946_s3 = inlined_call_operand.vmem [shape: f32[26,32], index: 3, kind: input, shape index: {}]   ;;  %s3947_s4 = inlined_call_operand.vmem [shape: f32[64,4], index: 4, kind: input, shape index: {}]   ;;  %s3948_s5 = inlined_call_operand.vmem [shape: f32[6,4], index: 5, kind: input, shape index: {}]   ;;  %s3949_s6 = inlined_call_operand.hbm [shape: f32[2,4], index: 6, kind: output, shape index: {}]  }
   0x1   :  { %v41_v0 = vld [vmem:[%s3943_s0] sm:$0xff]  ;;  %v44_v1 = vld [vmem:[%s3943_s0 + $0x18] sm:$0xff]  ;;  %v42_v2 = vld [vmem:[%s3943_s0 + $0x8] sm:$0xff] }
   0x2   :  { %75 = vrot.lane.b32.xlu0 %v41_v0, %s2987_s27  ;;  %v58_v4 = vrot.slane %v41_v0, 1  ;;  %81 = vrot.lane.b32.xlu1 %v44_v1, %s2987_s27  ;;  %v43_v5 = vld [vmem:[%s3943_s0 + $0x10] sm:$0xff]  ;;  %v113_v6 = vld [vmem:[%s3944_s1] sm:$0xff]  ;;  %v45_v7 = vrot.slane %v41_v0, 7  ;;  %v48_v8 = vrot.slane %v44_v1, 7  ;;  %v59_v9 = vrot.slane %v42_v2, 1 }
   0x3   :  { %v3046_v10 = vshrl.u32 %v24_v3, 7  ;;  %v114_v11 = vld [vmem:[%s3944_s1 + $0x8] sm:$0xff]  ;;  %v115_v12 = vld [vmem:[%s3944_s1 + $0x10] sm:$0xff]  ;;  %v61_v13 = vrot.slane %v44_v1, 1  ;;  %v47_v14 = vrot.slane %v43_v5, 7  ;;  %v60_v15 = vrot.slane %v43_v5, 1 }
   0x4   :  { %v2722_v16 = vpack.c.bf16 %v114_v11, %v113_v6  ;;  %v116_v17 = vld [vmem:[%s3944_s1 + $0x18] sm:$0xff]  ;;  %v117_v21 = vld [vmem:[%s3944_s1 + $0x20] sm:$0xff]  ;;  %v118_v22 = vld [vmem:[%s3944_s1 + $0x28] sm:$0xff]  ;;  %v46_v23 = vrot.slane %v42_v2, 7 }
   0x5   :  { %vm62_vm0 = vcmp.lt.s32.totalorder %v3046_v10, 7  ;;  %v3059_v18 = vadd.s32 8, %v3046_v10  ;;  %v3062_v19 = vadd.s32 24, %v3046_v10  ;;  %v2726_v20 = vpack.c.bf16 %v116_v17, %v115_v12 }
   0x6   :  { %77 = vrot.lane.b32.xlu0 %v42_v2, %s2987_s27  ;;  %v65_v24 = vsel %vm62_vm0, %v58_v4, %v59_v9  ;;  %v64_v26 = vsel %vm62_vm0, %v59_v9, %v60_v15  ;;  %2723 = vmatprep.subr.bf16.mxu0 %v2722_v16 }
   0x7   :  { %91 = vrot.lane.b32.xlu1 %v65_v24, %s2988_s17  ;;  %v30_v25 = vand.u32 15, %v3059_v18  ;;  %v32_v27 = vand.u32 15, %v3062_v19 }
   0x8   :  { %11 = vsyncpa [#allocation3], 0  ;;  %v66_v28 = vsel %vm62_vm0, %v61_v13, %v58_v4  ;;  %2725 = vmatpush3.bf16.msra.mxu0 %v2722_v16  ;;  %v2730_v29 = vpack.c.bf16 %v118_v22, %v117_v21  ;;  %vm49_vm1 = vcmp.lt.s32.totalorder %v3046_v10, 1  ;;  %v119_v35 = vld [vmem:[%s3944_s1 + $0x30] sm:$0xff]  ;;  %v120_v36 = vld [vmem:[%s3944_s1 + $0x38] sm:$0xff]  ;;  %v63_v38 = vsel %vm62_vm0, %v60_v15, %v61_v13  ;;  %s2992_s13 = smov [#allocation2]  }
   0x9   :  { %vm3083_vm2 = vcmp.lt.s32.totalorder %v30_v25, 15  ;;  %vm3089_vm3 = vcmp.lt.s32.totalorder %v32_v27, 15  ;;  %2727 = vmatprep.subr.bf16.mxu0 %v2726_v20  ;;  %v53_v32 = vsel %vm49_vm1, %v48_v8, %v45_v7  ;;  %v50_v33 = vsel %vm49_vm1, %v47_v14, %v48_v8  ;;  %v121_v42 = vld [vmem:[%s3944_s1 + $0x40] sm:$0xff]  ;;  %v122_v43 = vld [vmem:[%s3944_s1 + $0x48] sm:$0xff]  ;;  %v123_v45 = vld [vmem:[%s3944_s1 + $0x50] sm:$0xff]  ;;  %s2081_s14 = sshll.u32 %s2992_s13, 4  ;;  %s2082_s14 = int_to_ptr.vmem [resolvable:$true] %s2081_s14 }
   0xa   :  { %79 = vrot.lane.b32.xlu0 %v43_v5, %s2987_s27  ;;  %v68_v34 = vsel %vm3083_vm2, %v64_v26, 0.0  ;;  %v52_v37 = vsel %vm49_vm1, %v45_v7, %v46_v23  ;;  %v51_v39 = vsel %vm49_vm1, %v46_v23, %v47_v14  ;;  %v70_v40 = vsel %vm3089_vm3, %v66_v28, 0.0  ;;  %v124_v46 = vld [vmem:[%s3944_s1 + $0x58] sm:$0xff]  ;;  %v2096_v8 = vld [vmem:[%s3944_s1 + $0x60] sm:$0xff]  ;;  %v2097_v9 = vld [vmem:[%s3944_s1 + $0x68] sm:$0xff]  ;;  %s2963_s15 = scalar_lea.vmem %s2082_s14, 32  ;;  %p2968_p1 = scmp.lt.s32.totalorder %s2082_s14, %s2082_s14 }
   0xb   :  { %93 = vrot.lane.b32.xlu1 %v68_v34, %s2988_s17  ;;  %v2734_v41 = vpack.c.bf16 %v120_v36, %v119_v35  ;;  %v2738_v44 = vpack.c.bf16 %v122_v43, %v121_v42  ;;  %v2742_v47 = vpack.c.bf16 %v124_v46, %v123_v45  ;;  %v29_v48 = vand.u32 15, %v3046_v10  ;;  %v2098_v11 = vld [vmem:[%s3944_s1 + $0x70] sm:$0xff]  ;;  %v2099_v13 = vld [vmem:[%s3944_s1 + $0x78] sm:$0xff]  ;;  %v2100_v15 = vld [vmem:[%s3944_s1 + $0x80] sm:$0xff]  ;;  %p2964_p0 = scmp.ne.s32.totalorder %s2082_s14, %s2963_s15  ;;  %p2969_p2 = scmp.lt.s32.totalorder %s2963_s15, %s2963_s15 }
   0xc   :  { %2729 = vmatpush3.bf16.msra.mxu0 %v2726_v20  ;;  %v27_v49 = vadd.s32 16, %v3046_v10  ;;  %vm103_vm5 = vcmask 261120   ;;  %vm108_vm6 = vcmask 523264   ;;  %vm130_vm7 = vcmask 785408   ;;  %v2101_v16 = vld [vmem:[%s3944_s1 + $0x88] sm:$0xff]  ;;  %v2102_v20 = vld [vmem:[%s3944_s1 + $0x90] sm:$0xff] }
   0xd   :  { %2731 = vmatprep.subr.bf16.mxu0 %v2730_v29  ;;  %vm3131_vm4 = vcmp.gt.s32.totalorder %v29_v48, 0  ;;  %v2746_v12 = vpack.c.bf16 %v2097_v9, %v2096_v8  ;;  %v2750_v14 = vpack.c.bf16 %v2099_v13, %v2098_v11  ;;  %v2754_v17 = vpack.c.bf16 %v2101_v16, %v2100_v15  ;;  %v2103_v21 = vld [vmem:[%s3944_s1 + $0x98] sm:$0xff]  ;;  %v2104_v23 = vld [vmem:[%s3944_s1 + $0xa0] sm:$0xff]  ;;  %v2105_v24 = vld [vmem:[%s3944_s1 + $0xa8] sm:$0xff]  ;;  %p2970_p3 = por %p2969_p2, %p2968_p1 }
   0xe   :  { %95 = vrot.lane.b32.xlu0 %v63_v38, %s2988_s17  ;;  %v54_v53 = vsel %vm3131_vm4, %v53_v32, 0.0  ;;  %v31_v54 = vand.u32 15, %v27_v49  ;;  %v2758_v22 = vpack.c.bf16 %v2103_v21, %v2102_v20  ;;  %v2089_v26 = vld [vmem:[%s3946_s3] ss:$0 sm:$0xff]  ;;  %v2762_v28 = vpack.c.bf16 %v2105_v24, %v2104_v23  ;;  %v2094_v34 = vld [vmem:[%s3946_s3 + $0x1] ss:$0 sm:$0xff] }
   0xf   :  { %97 = vrot.lane.b32.xlu1 %v70_v40, %s2988_s17  ;;  %2747 = vmatprep.subr.bf16.mxu1 %v2746_v12  ;;  %v2106_v36 = vld [vmem:[%s3944_s1 + $0xb0] sm:$0xff]  ;;  %v2095_v42 = vld [vmem:[%s3946_s3 + $0x2] ss:$0 sm:$0xff]  ;;  %v782_v59 = vand.u32 127, %v24_v3  ;;  %vm764_vm10 = vcmp.lt.s32.totalorder %v3046_v10, 6  ;;  %vm3393_vm11 = vcmp.lt.s32.totalorder %v32_v27, 14  ;;  %p2971_p4 = pnand %p2970_p3, %p2964_p0 }
  0x10   :  { %2733 = vmatpush3.bf16.msra.mxu0 %v2730_v29  ;;  %vm3139_vm8 = vcmp.gt.s32.totalorder %v31_v54, 0  ;;  %2749 = vmatpush3.bf16.msra.mxu1 %v2746_v12  ;;  %vm3405_vm12 = vcmp.lt.s32.totalorder %v30_v25, 14 }
  0x11   :  { %2735 = vmatprep.subr.bf16.mxu0 %v2734_v41  ;;  %v56_v62 = vsel %vm3139_vm8, %v51_v39, 0.0  ;;  %2751 = vmatprep.subr.bf16.mxu1 %v2750_v14 }
  0x14   :  { %2737 = vmatpush3.bf16.msra.mxu0 %v2734_v41  ;;  %2753 = vmatpush3.bf16.msra.mxu1 %v2750_v14 }
  0x15   :  { %2739 = vmatprep.subr.bf16.mxu0 %v2738_v44  ;;  %2755 = vmatprep.subr.bf16.mxu1 %v2754_v17 }
  0x18   :  { %2741 = vmatpush3.bf16.msra.mxu0 %v2738_v44  ;;  %2757 = vmatpush3.bf16.msra.mxu1 %v2754_v17 }
  0x19   :  { %2743 = vmatprep.subr.bf16.mxu0 %v2742_v47  ;;  %2759 = vmatprep.subr.bf16.mxu1 %v2758_v22 }
  0x1c   :  { %2745 = vmatpush3.bf16.msra.mxu0 %v2742_v47  ;;  %2761 = vmatpush3.bf16.msra.mxu1 %v2758_v22 }
  0x1d   :  { %2763 = vmatprep.subr.bf16.mxu1 %v2762_v28 }
  0x20   :  { %2765 = vmatpush3.bf16.msra.mxu1 %v2762_v28 }
  0x74   :  { %v76_v51 = vpop.permute.xlu0 %75  ;;  %v82_v52 = vpop.permute.xlu1 %81 }
  0x75   :  { %v104_v56 = vsel %vm103_vm5, %v54_v53, %v76_v51  ;;  %v107_v4 = vsel %vm103_vm5, %v50_v33, %v82_v52 }
  0x78   :  { %v78_v55 = vpop.permute.xlu0 %77 }
  0x79   :  { %v92_v57 = vpop.permute.xlu1 %91  ;;  %v105_v61 = vsel %vm103_vm5, %v52_v37, %v78_v55  ;;  %v2107_v37 = vld [vmem:[%s3944_s1 + $0xb8] sm:$0xff] }
  0x7a   :  { %v109_v58 = vsel %vm108_vm6, %v104_v56, %v92_v57  ;;  %v2766_v39 = vpack.c.bf16 %v2107_v37, %v2106_v36 }
  0x7b   :  { %2430 = vmatprep.mubr.msk.f32.mxu0 %vm130_vm7, %v109_v58 }
  0x7c   :  { %v80_v60 = vpop.permute.xlu0 %79  ;;  %2767 = vmatprep.subr.bf16.mxu1 %v2766_v39 }
  0x7d   :  { %v94_v63 = vpop.permute.xlu1 %93  ;;  %v106_v1 = vsel %vm103_vm5, %v56_v62, %v80_v60  ;;  %2769 = vmatpush3.bf16.msra.mxu1 %v2766_v39 }
  0x7e   :  { %v110_v0 = vsel %vm108_vm6, %v105_v61, %v94_v63 }
  0x7f   :  { %2431 = vmatmul.mubr.msk.f32.vlgmr.msra.gmra.mrb[0].mxu0 %vm130_vm7, %v110_v0 }
  0x80   :  { %v96_v2 = vpop.permute.xlu0 %95 }
  0x81   :  { %v111_v5 = vsel %vm108_vm6, %v106_v1, %v96_v2  ;;  %v98_v6 = vpop.permute.xlu1 %97 }
  0x82   :  { %v112_v7 = vsel %vm108_vm6, %v107_v4, %v98_v6  ;;  %2433 = vmatprep.mubr.msk.f32.mxu0 %vm130_vm7, %v111_v5 }
  0x83   :  { %2434 = vmatmul.mubr.msk.f32.gmra.mrb[2].mxu0 %vm130_vm7, %v112_v7 }
 0x152   :  { %v2432_v29 = vpop.f32.mrb[0].mxu0 }
 0x153   :  { %v3188_v32 = vadd.f32 %v2432_v29, %v2089_v26  ;;  %v209_v33 = vpop.f32.mrb[1].mxu0 }
 0x154   :  { %v3193_v35 = vadd.f32 %v2089_v26, %v209_v33 }
 0x155   :  { %v229_v38 = vmax.f32 %v3188_v32, 0.0  ;;  %v2127_v32 = vld [vmem:[%s3946_s3 + $0x6] ss:$0 sm:$0xff] }
 0x156   :  { %v228_v40 = vmax.f32 %v3193_v35, 0.0  ;;  %v2435_v41 = vpop.f32.mrb[2].mxu0  ;;  %v2989_v35 = vmov 0.0  }
 0x157   :  { %v238_v43 = vmul.f32 %v2094_v34, %v229_v38  ;;  %v3208_v44 = vadd.f32 %v2435_v41, %v2089_v26  ;;  %v219_v45 = vpop.f32.mrb[3].mxu0 }
 0x158   :  { %v237_v46 = vmul.f32 %v2094_v34, %v228_v40  ;;  %v3212_v47 = vadd.f32 %v2089_v26, %v219_v45 }
 0x159   :  { %v231_v48 = vmax.f32 %v3208_v44, 0.0  ;;  %v247_v49 = vadd.f32 %v2095_v42, %v238_v43 }
 0x15a   :  { %v230_v51 = vmax.f32 %v3212_v47, 0.0  ;;  %v246_v52 = vadd.f32 %v2095_v42, %v237_v46 }
 0x15b   :  { %v240_v53 = vmul.f32 %v2094_v34, %v231_v48  ;;  %v251_v54 = vmax.f32 %v247_v49, 0.0  ;;  %v2115_v49 = vld [vmem:[%s3944_s1 + $0xc0] sm:$0xff] }
 0x15c   :  { %v239_v55 = vmul.f32 %v2094_v34, %v230_v51  ;;  %v250_v56 = vmax.f32 %v246_v52, 0.0  ;;  %v2116_v52 = vld [vmem:[%s3944_s1 + $0xc8] sm:$0xff] }
 0x15d   :  { %284 = vrot.lane.b32.xlu1 %v251_v54, %s2987_s27  ;;  %v249_v57 = vadd.f32 %v2095_v42, %v240_v53  ;;  %v267_v58 = vrot.slane %v251_v54, 1  ;;  %v255_v60 = vrot.slane %v251_v54, 7  ;;  %v2117_v53 = vld [vmem:[%s3944_s1 + $0xd0] sm:$0xff]  ;;  %v2770_v54 = vpack.c.bf16 %v2116_v52, %v2115_v49 }
 0x15e   :  { %282 = vrot.lane.b32.xlu0 %v250_v56, %s2987_s27  ;;  %v266_v61 = vrot.slane %v250_v56, 1  ;;  %v248_v62 = vadd.f32 %v2095_v42, %v239_v55  ;;  %v254_v63 = vrot.slane %v250_v56, 7  ;;  %v2118_v55 = vld [vmem:[%s3944_s1 + $0xd8] sm:$0xff] }
 0x15f   :  { %v253_v0 = vmax.f32 %v249_v57, 0.0  ;;  %v2774_v56 = vpack.c.bf16 %v2118_v55, %v2117_v53  ;;  %v2119_v57 = vld [vmem:[%s3944_s1 + $0xe0] sm:$0xff]  ;;  %2771 = vmatprep.subr.bf16.mxu0 %v2770_v54 }
 0x160   :  { %v272_v1 = vsel %vm62_vm0, %v266_v61, %v267_v58  ;;  %v252_v2 = vmax.f32 %v248_v62, 0.0  ;;  %v260_v4 = vsel %vm49_vm1, %v254_v63, %v255_v60  ;;  %2773 = vmatpush3.bf16.msra.mxu0 %v2770_v54  ;;  %v2122_v62 = vld [vmem:[%s3944_s1 + $0xf8] sm:$0xff] }
 0x161   :  { %288 = vrot.lane.b32.xlu1 %v253_v0, %s2987_s27  ;;  %v257_v5 = vrot.slane %v253_v0, 7  ;;  %v269_v7 = vrot.slane %v253_v0, 1  ;;  %2775 = vmatprep.subr.bf16.mxu0 %v2774_v56  ;;  %v2123_v0 = vld [vmem:[%s3944_s1 + $0x100] sm:$0xff] }
 0x162   :  { %298 = vrot.lane.b32.xlu0 %v272_v1, %s2988_s17  ;;  %v268_v6 = vrot.slane %v252_v2, 1  ;;  %v256_v8 = vrot.slane %v252_v2, 7  ;;  %v2124_v1 = vld [vmem:[%s3944_s1 + $0x108] sm:$0xff] }
 0x163   :  { %v261_v9 = vsel %vm49_vm1, %v257_v5, %v254_v63  ;;  %v273_v15 = vsel %vm62_vm0, %v269_v7, %v266_v61  ;;  %v2121_v61 = vld [vmem:[%s3944_s1 + $0xf0] sm:$0xff] }
 0x164   :  { %v271_v11 = vsel %vm62_vm0, %v267_v58, %v268_v6  ;;  %v258_v13 = vsel %vm49_vm1, %v256_v8, %v257_v5  ;;  %v259_v14 = vsel %vm49_vm1, %v255_v60, %v256_v8  ;;  %v277_v16 = vsel %vm3089_vm3, %v273_v15, 0.0  ;;  %v2120_v58 = vld [vmem:[%s3944_s1 + $0xe8] sm:$0xff]  ;;  %2777 = vmatpush3.bf16.msra.mxu0 %v2774_v56 }
 0x165   :  { %v275_v12 = vsel %vm3083_vm2, %v271_v11, 0.0  ;;  %v270_v17 = vsel %vm62_vm0, %v268_v6, %v269_v7  ;;  %v262_v22 = vsel %vm3131_vm4, %v261_v9, 0.0  ;;  %v264_v37 = vsel %vm3139_vm8, %v259_v14, 0.0  ;;  %v2113_v6 = vld [vmem:[%s3946_s3 + $0x4] ss:$0 sm:$0xff]  ;;  %v2125_v9 = vld [vmem:[%s3944_s1 + $0x110] sm:$0xff] }
 0x166   :  { %286 = vrot.lane.b32.xlu0 %v252_v2, %s2987_s27  ;;  %300 = vrot.lane.b32.xlu1 %v275_v12, %s2988_s17  ;;  %v2778_v60 = vpack.c.bf16 %v2120_v58, %v2119_v57  ;;  %v2782_v63 = vpack.c.bf16 %v2122_v62, %v2121_v61  ;;  %v2108_v2 = vld [vmem:[%s3946_s3 + $0x3] ss:$0 sm:$0xff]  ;;  %v2126_v11 = vld [vmem:[%s3944_s1 + $0x118] sm:$0xff] }
 0x167   :  { %v2790_v14 = vpack.c.bf16 %v2126_v11, %v2125_v9 }
 0x168   :  { %2779 = vmatprep.subr.bf16.mxu0 %v2778_v60 }
 0x169   :  { %2781 = vmatpush3.bf16.msra.mxu0 %v2778_v60 }
 0x16a   :  { %304 = vrot.lane.b32.xlu1 %v277_v16, %s2988_s17  ;;  %302 = vrot.lane.b32.xlu0 %v270_v17, %s2988_s17 }
 0x16b   :  { %2783 = vmatprep.subr.bf16.mxu0 %v2782_v63 }
 0x16d   :  { %2785 = vmatpush3.bf16.msra.mxu0 %v2782_v63 }
 0x1cf   :  { %v285_v20 = vpop.permute.xlu1 %284 }
 0x1d0   :  { %v283_v21 = vpop.permute.xlu0 %282  ;;  %v311_v29 = vsel %vm103_vm5, %v260_v4, %v285_v20  ;;  %v2786_v4 = vpack.c.bf16 %v2124_v1, %v2123_v0 }
 0x1d1   :  { %v310_v24 = vsel %vm103_vm5, %v262_v22, %v283_v21  ;;  %v634_v21 = vld [vmem:[%s3945_s2] sm:$0xff]  ;;  %v635_v22 = vld [vmem:[%s3945_s2 + $0x8] sm:$0xff] }
 0x1d2   :  { %2787 = vmatprep.subr.bf16.mxu0 %v2786_v4 }
 0x1d3   :  { %v289_v23 = vpop.permute.xlu1 %288  ;;  %2789 = vmatpush3.bf16.msra.mxu0 %v2786_v4 }
 0x1d4   :  { %v299_v26 = vpop.permute.xlu0 %298  ;;  %v313_v39 = vsel %vm103_vm5, %v258_v13, %v289_v23  ;;  %v2114_v13 = vld [vmem:[%s3946_s3 + $0x5] ss:$0 sm:$0xff]  ;;  %2791 = vmatprep.subr.bf16.mxu0 %v2790_v14 }
 0x1d5   :  { %v314_v28 = vsel %vm108_vm6, %v310_v24, %v299_v26 }
 0x1d6   :  { %2460 = vmatprep.mubr.msk.f32.mxu1 %vm130_vm7, %v314_v28  ;;  %v2794_v28 = vpack.c.bf16 %v635_v22, %v634_v21 }
 0x1d7   :  { %2793 = vmatpush3.bf16.msra.mxu0 %v2790_v14  ;;  %v637_v14 = vld [vmem:[%s3945_s2 + $0x18] sm:$0xff] }
 0x1d8   :  { %v287_v33 = vpop.permute.xlu0 %286  ;;  %v301_v34 = vpop.permute.xlu1 %300  ;;  %2795 = vmatprep.subr.bf16.mxu0 %v2794_v28 }
 0x1d9   :  { %v315_v36 = vsel %vm108_vm6, %v311_v29, %v301_v34  ;;  %v312_v41 = vsel %vm103_vm5, %v264_v37, %v287_v33 }
 0x1da   :  { %2461 = vmatmul.mubr.msk.f32.vlgmr.msra.gmra.mrb[0].mxu1 %vm130_vm7, %v315_v36 }
 0x1dc   :  { %v303_v42 = vpop.permute.xlu0 %302  ;;  %v305_v43 = vpop.permute.xlu1 %304 }
 0x1dd   :  { %v316_v45 = vsel %vm108_vm6, %v312_v41, %v303_v42  ;;  %v317_v46 = vsel %vm108_vm6, %v313_v39, %v305_v43 }
 0x1de   :  { %2463 = vmatprep.mubr.msk.f32.mxu1 %vm130_vm7, %v316_v45 }
 0x1df   :  { %2464 = vmatmul.mubr.msk.f32.gmra.mrb[2].mxu1 %vm130_vm7, %v317_v46 }
 0x2ad   :  { %v2462_v5 = vpop.f32.mrb[0].mxu1 }
 0x2ae   :  { %v420_v7 = vadd.f32 %v2462_v5, %v2108_v2  ;;  %v414_v8 = vpop.f32.mrb[1].mxu1 }
 0x2af   :  { %v415_v12 = vadd.f32 %v2108_v2, %v414_v8 }
 0x2b0   :  { %v439_v15 = vmul.f32 %v2113_v6, %v420_v7 }
 0x2b1   :  { %v438_v16 = vmul.f32 %v2113_v6, %v415_v12 }
 0x2b2   :  { %v2465_v17 = vpop.f32.mrb[2].mxu1  ;;  %v448_v20 = vadd.f32 %v2114_v13, %v439_v15 }
 0x2b3   :  { %v430_v23 = vadd.f32 %v2465_v17, %v2108_v2  ;;  %v424_v24 = vpop.f32.mrb[3].mxu1  ;;  %v447_v26 = vadd.f32 %v2114_v13, %v438_v16 }
 0x2b4   :  { %v425_v29 = vadd.f32 %v2108_v2, %v424_v24  ;;  %v452_v33 = vmax.f32 %v448_v20, 0.0 }
 0x2b5   :  { %v441_v34 = vmul.f32 %v2113_v6, %v430_v23  ;;  %v451_v36 = vmax.f32 %v447_v26, 0.0 }
 0x2b6   :  { %v440_v37 = vmul.f32 %v2113_v6, %v425_v29  ;;  %485 = vrot.lane.b32.xlu1 %v452_v33, %s2987_s27  ;;  %v468_v39 = vrot.slane %v452_v33, 1  ;;  %v456_v41 = vrot.slane %v452_v33, 7 }
 0x2b7   :  { %483 = vrot.lane.b32.xlu0 %v451_v36, %s2987_s27  ;;  %v467_v42 = vrot.slane %v451_v36, 1  ;;  %v450_v43 = vadd.f32 %v2114_v13, %v441_v34  ;;  %v455_v45 = vrot.slane %v451_v36, 7 }
 0x2b8   :  { %v449_v46 = vadd.f32 %v2114_v13, %v440_v37  ;;  %v636_v13 = vld [vmem:[%s3945_s2 + $0x10] sm:$0xff] }
 0x2b9   :  { %v473_v49 = vsel %vm62_vm0, %v467_v42, %v468_v39  ;;  %v454_v52 = vmax.f32 %v450_v43, 0.0  ;;  %v461_v53 = vsel %vm49_vm1, %v455_v45, %v456_v41  ;;  %v2798_v17 = vpack.c.bf16 %v637_v14, %v636_v13 }
 0x2ba   :  { %v453_v54 = vmax.f32 %v449_v46, 0.0 }
 0x2bb   :  { %499 = vrot.lane.b32.xlu0 %v473_v49, %s2988_s17  ;;  %489 = vrot.lane.b32.xlu1 %v454_v52, %s2987_s27  ;;  %v458_v55 = vrot.slane %v454_v52, 7  ;;  %v470_v56 = vrot.slane %v454_v52, 1 }
 0x2bc   :  { %v469_v57 = vrot.slane %v453_v54, 1  ;;  %v457_v58 = vrot.slane %v453_v54, 7 }
 0x2bd   :  { %v474_v60 = vsel %vm62_vm0, %v470_v56, %v467_v42  ;;  %v462_v61 = vsel %vm49_vm1, %v458_v55, %v455_v45 }
 0x2be   :  { %v472_v62 = vsel %vm62_vm0, %v468_v39, %v469_v57  ;;  %v471_v63 = vsel %vm62_vm0, %v469_v57, %v470_v56  ;;  %v459_v1 = vsel %vm49_vm1, %v457_v58, %v458_v55  ;;  %v460_v2 = vsel %vm49_vm1, %v456_v41, %v457_v58 }
 0x2bf   :  { %487 = vrot.lane.b32.xlu0 %v453_v54, %s2987_s27  ;;  %v476_v0 = vsel %vm3083_vm2, %v472_v62, 0.0  ;;  %v478_v4 = vsel %vm3089_vm3, %v474_v60, 0.0  ;;  %v463_v7 = vsel %vm3131_vm4, %v462_v61, 0.0  ;;  %v465_v21 = vsel %vm3139_vm8, %v460_v2, 0.0 }
 0x2c0   :  { %501 = vrot.lane.b32.xlu1 %v476_v0, %s2988_s17 }
 0x2c3   :  { %503 = vrot.lane.b32.xlu0 %v471_v63, %s2988_s17 }
 0x2c4   :  { %505 = vrot.lane.b32.xlu1 %v478_v4, %s2988_s17 }
 0x328   :  { %v486_v5 = vpop.permute.xlu1 %485 }
 0x329   :  { %v484_v6 = vpop.permute.xlu0 %483  ;;  %v512_v50 = vsel %vm103_vm5, %v461_v53, %v486_v5 }
 0x32a   :  { %v511_v8 = vsel %vm103_vm5, %v463_v7, %v484_v6 }
 0x32d   :  { %v500_v9 = vpop.permute.xlu0 %499  ;;  %v490_v11 = vpop.permute.xlu1 %489 }
 0x32e   :  { %v515_v12 = vsel %vm108_vm6, %v511_v8, %v500_v9  ;;  %v514_v24 = vsel %vm103_vm5, %v459_v1, %v490_v11 }
 0x32f   :  { %2490 = vmatprep.mubr.msk.f32.mxu0 %vm130_vm7, %v515_v12 }
 0x331   :  { %v488_v15 = vpop.permute.xlu0 %487 }
 0x332   :  { %v502_v16 = vpop.permute.xlu1 %501  ;;  %v513_v22 = vsel %vm103_vm5, %v465_v21, %v488_v15  ;;  %v784_v15 = vmul.u32 2, %v3059_v18  ;;  %v2146_v21 = vld [vmem:[%s3944_s1 + $0x138] sm:$0xff] }
 0x333   :  { %v516_v20 = vsel %vm108_vm6, %v512_v50, %v502_v16  ;;  %v2143_v50 = vld [vmem:[%s3944_s1 + $0x120] sm:$0xff]  ;;  %v2144_v16 = vld [vmem:[%s3944_s1 + $0x128] sm:$0xff] }
 0x334   :  { %2491 = vmatmul.mubr.msk.f32.vlgmr.msra.gmra.mrb[4].mxu0 %vm130_vm7, %v516_v20  ;;  %vm786_vm13 = vcmp.eq.s32.totalorder %v782_v59, %v784_v15  ;;  %v2810_v20 = vpack.c.bf16 %v2144_v16, %v2143_v50  ;;  %v2166_v15 = vld [vmem:[%s3944_s1 + $0x1b0] sm:$0xff]  ;;  %v2168_v16 = vld [vmem:[%s3944_s1 + $0x1c0] sm:$0xff] }
 0x335   :  { %v504_v23 = vpop.permute.xlu0 %503  ;;  %2797 = vmatpush3.bf16.msra.mxu0 %v2794_v28  ;;  %v783_v28 = vmul.u32 2, %v3046_v10  ;;  %v2138_v30 = vsel %vm786_vm13, 1.0, %v2989_v35 }
 0x336   :  { %v517_v26 = vsel %vm108_vm6, %v513_v22, %v504_v23  ;;  %v506_v29 = vpop.permute.xlu1 %505  ;;  %2799 = vmatprep.subr.bf16.mxu0 %v2798_v17  ;;  %v2147_v23 = vld [vmem:[%s3944_s1 + $0x140] sm:$0xff] }
 0x337   :  { %v518_v33 = vsel %vm108_vm6, %v514_v24, %v506_v29  ;;  %2493 = vmatprep.mubr.msk.f32.mxu0 %vm130_vm7, %v517_v26  ;;  %vm785_vm9 = vcmp.eq.s32.totalorder %v782_v59, %v783_v28  ;;  %v2148_v24 = vld [vmem:[%s3944_s1 + $0x148] sm:$0xff]  ;;  %v2149_v29 = vld [vmem:[%s3944_s1 + $0x150] sm:$0xff]  ;;  %v2151_v28 = vld [vmem:[%s3944_s1 + $0x160] sm:$0xff] }
 0x338   :  { %2494 = vmatmul.mubr.msk.f32.gmra.mrb[6].mxu0 %vm130_vm7, %v518_v33  ;;  %v2818_v26 = vpack.c.bf16 %v2148_v24, %v2147_v23  ;;  %v2150_v33 = vld [vmem:[%s3944_s1 + $0x158] sm:$0xff]  ;;  %v2155_v23 = vld [vmem:[%s3946_s3 + $0xa] ss:$0 sm:$0xff] }
 0x339   :  { %2801 = vmatpush3.bf16.msra.mxu0 %v2798_v17  ;;  %2504 = vmatprep.mubr.msk.f32.mxu0 %vm103_vm5, %v228_v40  ;;  %v3380_v40 = vsel %vm785_vm9, 1.0, %v2989_v35  ;;  %v2145_v17 = vld [vmem:[%s3944_s1 + $0x130] sm:$0xff]  ;;  %v2822_v59 = vpack.c.bf16 %v2150_v33, %v2149_v29  ;;  %v2158_v29 = vld [vmem:[%s3946_s3 + $0xb] ss:$0 sm:$0xff] }
 0x33a   :  { %2518 = vmatprep.mubr.msk.f32.mxu1 %vm103_vm5, %v3380_v40  ;;  %v2814_v22 = vpack.c.bf16 %v2146_v21, %v2145_v17  ;;  %v2169_v17 = vld [vmem:[%s3944_s1 + $0x1c8] sm:$0xff]  ;;  %v2170_v21 = vld [vmem:[%s3944_s1 + $0x1d0] sm:$0xff] }
 0x33c   :  { %2505 = vmatmul.mubr.msk.f32.vlgmr.msra.gmra.mrb[4].mxu0 %vm103_vm5, %v229_v38  ;;  %v2132_v38 = vld [vmem:[%s3946_s3 + $0x7] ss:$0 sm:$0xff] }
 0x33d   :  { %2507 = vmatprep.mubr.msk.f32.mxu0 %vm103_vm5, %v230_v51 }
 0x340   :  { %2508 = vmatmul.mubr.msk.f32.gmra.mrb[6].mxu0 %vm103_vm5, %v231_v48  ;;  %v2951_v48 = vadd.f32 %v2132_v38, %v2127_v32 }
 0x40f   :  { %v2506_v44 = vpop.f32.mrb[4].mxu0 }
 0x410   :  { %v2945_v3 = vadd.f32 %v2506_v44, %v2127_v32  ;;  %v721_v47 = vpop.f32.mrb[5].mxu0  ;;  %v2153_v44 = vld [vmem:[%s3944_s1 + $0x170] sm:$0xff] }
 0x411   :  { %v2947_v51 = vadd.f32 %v2127_v32, %v721_v47  ;;  %v2152_v32 = vld [vmem:[%s3944_s1 + $0x168] sm:$0xff] }
 0x412   :  { %v2946_v34 = vadd.f32 %v2945_v3, %v2132_v38  ;;  %v2154_v3 = vld [vmem:[%s3944_s1 + $0x178] sm:$0xff] }
 0x413   :  { %v2948_v36 = vadd.f32 %v2947_v51, %v2132_v38  ;;  %v2509_v37 = vpop.f32.mrb[6].mxu0  ;;  %v2826_v38 = vpack.c.bf16 %v2152_v32, %v2151_v28  ;;  %v2830_v47 = vpack.c.bf16 %v2154_v3, %v2153_v44  ;;  %v2159_v32 = vld [vmem:[%s3946_s3 + $0xc] ss:$0 sm:$0xff] }
 0x414   :  { %v745_v39 = vrot.slane %v2946_v34, 1  ;;  %v761_v41 = vrot.slane %v2946_v34, 2  ;;  %v2950_v42 = vadd.f32 %v2951_v48, %v2509_v37  ;;  %v731_v43 = vpop.f32.mrb[7].mxu0 }
 0x415   :  { %v744_v45 = vrot.slane %v2948_v36, 1  ;;  %v760_v46 = vrot.slane %v2948_v36, 2  ;;  %v2952_v49 = vadd.f32 %v2951_v48, %v731_v43  ;;  %v2141_v48 = vld [vmem:[%s3946_s3 + $0x8] ss:$0 sm:$0xff]  ;;  %v3479_v43 = vand.u32 7, %v3059_v18 }
 0x416   :  { %v747_v52 = vrot.slane %v2950_v42, 1  ;;  %v763_v53 = vrot.slane %v2950_v42, 2 }
 0x417   :  { %v750_v55 = vsel %vm62_vm0, %v744_v45, %v745_v39  ;;  %v746_v56 = vrot.slane %v2952_v49, 1  ;;  %v762_v57 = vrot.slane %v2952_v49, 2  ;;  %v767_v58 = vsel %vm764_vm10, %v760_v46, %v761_v41 }
 0x418   :  { %v773_v60 = vmax.f32 %v2948_v36, %v750_v55  ;;  %v751_v61 = vsel %vm62_vm0, %v747_v52, %v744_v45  ;;  %v768_v27 = vsel %vm764_vm10, %v763_v53, %v760_v46  ;;  %v3482_v45 = vand.u32 7, %v3046_v10 }
 0x419   :  { %v755_v62 = vsel %vm3089_vm3, %v751_v61, 0.0  ;;  %v748_v63 = vsel %vm62_vm0, %v746_v56, %v747_v52  ;;  %v749_v0 = vsel %vm62_vm0, %v745_v39, %v746_v56  ;;  %v766_v1 = vsel %vm764_vm10, %v761_v41, %v762_v57 }
 0x41a   :  { %v776_v2 = vmax.f32 %v2950_v42, %v755_v62  ;;  %v775_v25 = vmax.f32 %v2952_v49, %v748_v63  ;;  %v753_v4 = vsel %vm3083_vm2, %v749_v0, 0.0  ;;  %v777_v6 = vmax.f32 %v773_v60, %v767_v58 }
 0x41b   :  { %v774_v5 = vmax.f32 %v2946_v34, %v753_v4  ;;  %v765_v31 = vsel %vm764_vm10, %v762_v57, %v763_v53  ;;  %v772_v7 = vsel %vm3393_vm11, %v768_v27, 0.0  ;;  %v770_v8 = vsel %vm3405_vm12, %v766_v1, 0.0  ;;  %v2142_v34 = vld [vmem:[%s3946_s3 + $0x9] ss:$0 sm:$0xff] }
 0x41c   :  { %v779_v9 = vmax.f32 %v775_v25, %v765_v31  ;;  %v780_v11 = vmax.f32 %v776_v2, %v772_v7  ;;  %vm877_vm14 = vcmp.lt.s32.totalorder %v3479_v43, 7  ;;  %vm876_vm15 = vcmp.lt.s32.totalorder %v3482_v45, 7  ;;  %v2161_v31 = vld [vmem:[%s3944_s1 + $0x188] sm:$0xff]  ;;  %v2162_v7 = vld [vmem:[%s3944_s1 + $0x190] sm:$0xff] }
 0x41d   :  { %v778_v12 = vmax.f32 %v774_v5, %v770_v8  ;;  %vm875_vm2 = vcmp.gt.s32.totalorder %v3479_v43, 0  ;;  %vm874_vm3 = vcmp.gt.s32.totalorder %v3482_v45, 0  ;;  %vm1180_vm4 = vcmp.lt.s32.totalorder %v3482_v45, 6  ;;  %v2179_v45 = vld [vmem:[%s3944_s1 + $0x1e8] sm:$0xff] }
 0x41e   :  { %v2806_v13 = vpack.c.bf16 %v780_v11, %v779_v9  ;;  %v2163_v9 = vld [vmem:[%s3944_s1 + $0x198] sm:$0xff]  ;;  %vm1181_vm8 = vcmp.lt.s32.totalorder %v3479_v43, 6  ;;  %v2178_v43 = vld [vmem:[%s3944_s1 + $0x1e0] sm:$0xff]  ;;  %vm1512_vm12 = vcmask 64512  }
 0x41f   :  { %v2802_v14 = vpack.c.bf16 %v778_v12, %v777_v6  ;;  %v2160_v6 = vld [vmem:[%s3944_s1 + $0x180] sm:$0xff]  ;;  %v2838_v11 = vpack.c.bf16 %v2163_v9, %v2162_v7 }
 0x420   :  { %v2834_v8 = vpack.c.bf16 %v2161_v31, %v2160_v6  ;;  %v2164_v12 = vld [vmem:[%s3944_s1 + $0x1a0] sm:$0xff] }
 0x421   :  { %2803 = vmatprep.subr.bf16.mxu1 %v2802_v14 }
 0x422   :  { %2805 = vmatpush3.bf16.msra.mxu1 %v2802_v14  ;;  %2835 = vmatprep.subr.bf16.mxu0 %v2834_v8 }
 0x423   :  { %2807 = vmatprep.subr.bf16.mxu1 %v2806_v13  ;;  %2837 = vmatpush3.bf16.msra.mxu0 %v2834_v8 }
 0x424   :  { %2839 = vmatprep.subr.bf16.mxu0 %v2838_v11 }
 0x426   :  { %2809 = vmatpush3.bf16.msra.mxu1 %v2806_v13  ;;  %v2165_v13 = vld [vmem:[%s3944_s1 + $0x1a8] sm:$0xff] }
 0x427   :  { %2811 = vmatprep.subr.bf16.mxu1 %v2810_v20  ;;  %v2842_v14 = vpack.c.bf16 %v2165_v13, %v2164_v12  ;;  %2841 = vmatpush3.bf16.msra.mxu0 %v2838_v11 }
 0x429   :  { %2519 = vmatmul.mubr.msk.f32.vlgmr.msra.gmra.mrb[4].mxu1 %vm103_vm5, %v2138_v30  ;;  %v2167_v30 = vld [vmem:[%s3944_s1 + $0x1b8] sm:$0xff]  ;;  %2843 = vmatprep.subr.bf16.mxu0 %v2842_v14 }
 0x42a   :  { %2813 = vmatpush3.bf16.msra.mxu1 %v2810_v20  ;;  %v2846_v50 = vpack.c.bf16 %v2167_v30, %v2166_v15  ;;  %v2850_v20 = vpack.c.bf16 %v2169_v17, %v2168_v16 }
 0x42b   :  { %2815 = vmatprep.subr.bf16.mxu1 %v2814_v22  ;;  %2845 = vmatpush3.bf16.msra.mxu0 %v2842_v14 }
 0x42c   :  { %2847 = vmatprep.subr.bf16.mxu0 %v2846_v50 }
 0x42e   :  { %2817 = vmatpush3.bf16.msra.mxu1 %v2814_v22  ;;  %v2171_v22 = vld [vmem:[%s3944_s1 + $0x1d8] sm:$0xff] }
 0x42f   :  { %2819 = vmatprep.subr.bf16.mxu1 %v2818_v26  ;;  %2849 = vmatpush3.bf16.msra.mxu0 %v2846_v50  ;;  %v2854_v24 = vpack.c.bf16 %v2171_v22, %v2170_v21 }
 0x430   :  { %2851 = vmatprep.subr.bf16.mxu0 %v2850_v20 }
 0x432   :  { %2821 = vmatpush3.bf16.msra.mxu1 %v2818_v26 }
 0x433   :  { %2823 = vmatprep.subr.bf16.mxu1 %v2822_v59  ;;  %2853 = vmatpush3.bf16.msra.mxu0 %v2850_v20 }
 0x434   :  { %2855 = vmatprep.subr.bf16.mxu0 %v2854_v24 }
 0x436   :  { %2825 = vmatpush3.bf16.msra.mxu1 %v2822_v59 }
 0x437   :  { %2827 = vmatprep.subr.bf16.mxu1 %v2826_v38  ;;  %2857 = vmatpush3.bf16.msra.mxu0 %v2854_v24  ;;  %v2862_v24 = vpack.c.bf16 %v2179_v45, %v2178_v43 }
 0x43a   :  { %2829 = vmatpush3.bf16.msra.mxu1 %v2826_v38 }
 0x43b   :  { %2831 = vmatprep.subr.bf16.mxu1 %v2830_v47 }
 0x43e   :  { %2833 = vmatpush3.bf16.msra.mxu1 %v2830_v47 }
 0x4fc   :  { %v3469_v51 = vpop.f32.mrb[4].mxu1 }
 0x4fd   :  { %v884_v36 = vmul.f32 %v3469_v51, %v2141_v48  ;;  %v3475_v37 = vpop.f32.mrb[5].mxu1 }
 0x4fe   :  { %v883_v39 = vmul.f32 %v2141_v48, %v3475_v37 }
 0x4ff   :  { %v891_v41 = vadd.f32 %v2142_v34, %v884_v36 }
 0x500   :  { %v890_v42 = vadd.f32 %v2142_v34, %v883_v39 }
 0x501   :  { %v893_v46 = vmax.f32 %v891_v41, 0.0 }
 0x502   :  { %v892_v49 = vmax.f32 %v890_v42, 0.0 }
 0x503   :  { %910 = vrot.lane.b32.xlu1 %v893_v46, %s2987_s27  ;;  %v895_v52 = vrot.slane %v893_v46, 7  ;;  %v901_v53 = vrot.slane %v893_v46, 1 }
 0x504   :  { %908 = vrot.lane.b32.xlu0 %v892_v49, %s2987_s27  ;;  %v894_v54 = vrot.slane %v892_v49, 7  ;;  %v900_v55 = vrot.slane %v892_v49, 1 }
 0x506   :  { %v903_v18 = vsel %vm62_vm0, %v901_v53, %v900_v55  ;;  %v902_v56 = vsel %vm62_vm0, %v900_v55, %v901_v53  ;;  %v896_v57 = vsel %vm49_vm1, %v894_v54, %v895_v52  ;;  %v897_v58 = vsel %vm49_vm1, %v895_v52, %v894_v54 }
 0x507   :  { %v905_v60 = vsel %vm877_vm14, %v903_v18, 0.0  ;;  %v904_v61 = vsel %vm876_vm15, %v902_v56, 0.0  ;;  %v899_v62 = vsel %vm875_vm2, %v896_v57, 0.0  ;;  %v898_v63 = vsel %vm874_vm3, %v897_v58, 0.0 }
 0x508   :  { %918 = vrot.lane.b32.xlu1 %v905_v60, %s2988_s17  ;;  %916 = vrot.lane.b32.xlu0 %v904_v61, %s2988_s17 }
 0x575   :  { %v911_v19 = vpop.permute.xlu1 %910 }
 0x576   :  { %v909_v27 = vpop.permute.xlu0 %908  ;;  %v923_v0 = vsel %vm103_vm5, %v899_v62, %v911_v19 }
 0x577   :  { %v922_v1 = vsel %vm103_vm5, %v898_v63, %v909_v27 }
 0x57a   :  { %v919_v2 = vpop.permute.xlu1 %918  ;;  %v917_v25 = vpop.permute.xlu0 %916 }
 0x57b   :  { %v925_v4 = vsel %vm108_vm6, %v923_v0, %v919_v2  ;;  %v924_v5 = vsel %vm108_vm6, %v922_v1, %v917_v25  ;;  %v2990_v0 = vmov 0.0|0.0   ;;  %v2172_v1 = vld [vmem:[%s3946_s3 + $0xd] ss:$0 sm:$0xff] }
 0x57c   :  { %2545 = vmatprep.mubr.msk.f32.mxu1 %vm130_vm7, %v924_v5  ;;  %2858 = vmatprep.subr.bf16.mxu1 %v2990_v0 }
 0x57d   :  { %2546 = vmatmul.mubr.msk.f32.vlgmr.msra.gmra.mrb[6].mxu1 %vm130_vm7, %v925_v4  ;;  %2879 = vmatprep.subr.bf16.mxu0 %v2990_v0 }
 0x650   :  { %v2547_v26 = vpop.f32.mrb[6].mxu1 }
 0x651   :  { %v1022_v33 = vadd.f32 %v2547_v26, %v2155_v23  ;;  %v1016_v59 = vpop.f32.mrb[7].mxu1  ;;  %v2181_v26 = vld [vmem:[%s3944_s1 + $0x1f8] sm:$0xff] }
 0x652   :  { %v1017_v28 = vadd.f32 %v2155_v23, %v1016_v59  ;;  %v2180_v23 = vld [vmem:[%s3944_s1 + $0x1f0] sm:$0xff]  ;;  %v2183_v59 = vld [vmem:[%s3944_s1 + $0x208] sm:$0xff] }
 0x653   :  { %v1031_v38 = vmul.f32 %v2158_v29, %v1022_v33  ;;  %v2182_v33 = vld [vmem:[%s3944_s1 + $0x200] sm:$0xff] }
 0x654   :  { %v1030_v44 = vmul.f32 %v2158_v29, %v1017_v28  ;;  %v2865_v29 = vpack.c.bf16 %v2181_v26, %v2180_v23  ;;  %v2868_v28 = vpack.c.bf16 %v2183_v59, %v2182_v33 }
 0x655   :  { %v1038_v3 = vadd.f32 %v2159_v32, %v1031_v38  ;;  %v2185_v38 = vld [vmem:[%s3944_s1 + $0x218] sm:$0xff] }
 0x656   :  { %v1037_v47 = vadd.f32 %v2159_v32, %v1030_v44  ;;  %v2184_v32 = vld [vmem:[%s3944_s1 + $0x210] sm:$0xff] }
 0x657   :  { %v1040_v48 = vmax.f32 %v1038_v3, 0.0  ;;  %v2871_v44 = vpack.c.bf16 %v2185_v38, %v2184_v32  ;;  %v2186_v3 = vld [vmem:[%s3944_s1 + $0x220] sm:$0xff]  ;;  %v2206_v32 = vld [vmem:[%s3946_s3 + $0x13] ss:$0 sm:$0xff] }
 0x658   :  { %v1039_v34 = vmax.f32 %v1037_v47, 0.0  ;;  %v2187_v47 = vld [vmem:[%s3944_s1 + $0x228] sm:$0xff] }
 0x659   :  { %1057 = vrot.lane.b32.xlu1 %v1040_v48, %s2987_s27  ;;  %v1042_v36 = vrot.slane %v1040_v48, 7  ;;  %v1048_v39 = vrot.slane %v1040_v48, 1  ;;  %v2874_v48 = vpack.c.bf16 %v2187_v47, %v2186_v3 }
 0x65a   :  { %1055 = vrot.lane.b32.xlu0 %v1039_v34, %s2987_s27  ;;  %v1041_v41 = vrot.slane %v1039_v34, 7  ;;  %v1047_v42 = vrot.slane %v1039_v34, 1  ;;  %v2188_v34 = vld [vmem:[%s3944_s1 + $0x230] sm:$0xff] }
 0x65c   :  { %v1050_v46 = vsel %vm62_vm0, %v1048_v39, %v1047_v42  ;;  %v1049_v49 = vsel %vm62_vm0, %v1047_v42, %v1048_v39  ;;  %v1043_v52 = vsel %vm49_vm1, %v1041_v41, %v1042_v36  ;;  %v1044_v53 = vsel %vm49_vm1, %v1042_v36, %v1041_v41  ;;  %v2189_v36 = vld [vmem:[%s3944_s1 + $0x238] sm:$0xff]  ;;  %v2176_v41 = vld [vmem:[%s3946_s3 + $0xe] ss:$0 sm:$0xff] }
 0x65d   :  { %v1052_v54 = vsel %vm877_vm14, %v1050_v46, 0.0  ;;  %v1051_v55 = vsel %vm876_vm15, %v1049_v49, 0.0  ;;  %v1046_v57 = vsel %vm875_vm2, %v1043_v52, 0.0  ;;  %v1045_v58 = vsel %vm874_vm3, %v1044_v53, 0.0  ;;  %v2177_v46 = vld [vmem:[%s3946_s3 + $0xf] ss:$0 sm:$0xff] }
 0x65e   :  { %1065 = vrot.lane.b32.xlu1 %v1052_v54, %s2988_s17  ;;  %1063 = vrot.lane.b32.xlu0 %v1051_v55, %s2988_s17  ;;  %vm2991_vm1 = vmmov 0   ;;  %v2877_v39 = vpack.c.bf16 %v2189_v36, %v2188_v34  ;;  %v3666_v53 = vand.u32 3, %v3046_v10 }
 0x65f   :  { %2579 = vmatprep.mubr.msk.f32.mxu1 %vm2991_vm1, %v2989_v35 }
 0x660   :  { %vm1267_vm9 = vcmp.lt.s32.totalorder %v3666_v53, 3  ;;  %vm1507_vm11 = vcmp.lt.s32.totalorder %v3666_v53, 2 }
 0x6cb   :  { %v1058_v18 = vpop.permute.xlu1 %1057 }
 0x6cc   :  { %v1056_v56 = vpop.permute.xlu0 %1055  ;;  %v1070_v60 = vsel %vm103_vm5, %v1046_v57, %v1058_v18 }
 0x6cd   :  { %v1069_v61 = vsel %vm103_vm5, %v1045_v58, %v1056_v56 }
 0x6d0   :  { %v1066_v19 = vpop.permute.xlu1 %1065  ;;  %v1064_v27 = vpop.permute.xlu0 %1063 }
 0x6d1   :  { %v1072_v62 = vsel %vm108_vm6, %v1070_v60, %v1066_v19  ;;  %v1071_v63 = vsel %vm108_vm6, %v1069_v61, %v1064_v27 }
 0x6d2   :  { %2572 = vmatprep.mubr.msk.f32.mxu0 %vm130_vm7, %v1071_v63  ;;  %v2195_v63 = vld [vmem:[%s3944_s1 + $0x248] sm:$0xff] }
 0x6d3   :  { %2573 = vmatmul.mubr.msk.f32.vlgmr.msra.gmra.mrb[8].mxu0 %vm130_vm7, %v1072_v62  ;;  %v2194_v62 = vld [vmem:[%s3944_s1 + $0x240] sm:$0xff] }
 0x6d4   :  { %2633 = vmatprep.mubr.msk.f32.mxu0 %vm2991_vm1, %v2989_v35 }
 0x7a6   :  { %v2574_v2 = vpop.f32.mrb[8].mxu0 }
 0x7a7   :  { %v1169_v25 = vadd.f32 %v2574_v2, %v2172_v1  ;;  %v1163_v4 = vpop.f32.mrb[9].mxu0  ;;  %v2880_v2 = vpack.c.bf16 %v2195_v63, %v2194_v62  ;;  %v2221_v62 = vld [vmem:[%s3944_s1 + $0x2f0] sm:$0xff]  ;;  %v2222_v63 = vld [vmem:[%s3944_s1 + $0x2f8] sm:$0xff] }
 0x7a8   :  { %v1164_v5 = vadd.f32 %v2172_v1, %v1163_v4  ;;  %v2196_v1 = vld [vmem:[%s3944_s1 + $0x250] sm:$0xff] }
 0x7a9   :  { %v1173_v6 = vadd.f32 %v3469_v51, %v1169_v25  ;;  %v2197_v25 = vld [vmem:[%s3944_s1 + $0x258] sm:$0xff]  ;;  %2881 = vmatpush3.bf16.msra.mxu0 %v2880_v2  ;;  %v2209_v2 = vld [vmem:[%s3946_s3 + $0x14] ss:$0 sm:$0xff] }
 0x7aa   :  { %v1172_v31 = vadd.f32 %v1164_v5, %v3475_v37  ;;  %v2883_v4 = vpack.c.bf16 %v2197_v25, %v2196_v1  ;;  %2882 = vmatprep.subr.bf16.mxu0 %v2990_v0  ;;  %v2198_v5 = vld [vmem:[%s3944_s1 + $0x260] sm:$0xff]  ;;  %v2913_v1 = vpack.c.bf16 %v2222_v63, %v2221_v62  ;;  %v2239_v62 = vld [vmem:[%s3946_s3 + $0x19] ss:$0 sm:$0xff] }
 0x7ab   :  { %v1175_v7 = vrot.slane %v1173_v6, 1  ;;  %v1183_v8 = vrot.slane %v1173_v6, 2 }
 0x7ac   :  { %v1174_v9 = vrot.slane %v1172_v31, 1  ;;  %v1182_v11 = vrot.slane %v1172_v31, 2 }
 0x7ad   :  { %2884 = vmatpush3.bf16.msra.mxu0 %v2883_v4  ;;  %v2210_v4 = vld [vmem:[%s3946_s3 + $0x15] ss:$0 sm:$0xff] }
 0x7ae   :  { %v1176_v12 = vsel %vm62_vm0, %v1174_v9, %v1175_v7  ;;  %v1177_v13 = vsel %vm62_vm0, %v1175_v7, %v1174_v9  ;;  %v1184_v14 = vsel %vm764_vm10, %v1182_v11, %v1183_v8  ;;  %v1185_v51 = vsel %vm764_vm10, %v1183_v8, %v1182_v11  ;;  %2885 = vmatprep.subr.bf16.mxu0 %v2990_v0  ;;  %v2200_v7 = vld [vmem:[%s3944_s1 + $0x270] sm:$0xff]  ;;  %v2201_v8 = vld [vmem:[%s3944_s1 + $0x278] sm:$0xff]  ;;  %v2202_v11 = vld [vmem:[%s3944_s1 + $0x280] sm:$0xff] }
 0x7af   :  { %v1178_v37 = vsel %vm876_vm15, %v1176_v12, 0.0  ;;  %v1179_v15 = vsel %vm877_vm14, %v1177_v13, 0.0  ;;  %v1186_v16 = vsel %vm1180_vm4, %v1184_v14, 0.0  ;;  %v1187_v17 = vsel %vm1181_vm8, %v1185_v51, 0.0  ;;  %v2203_v12 = vld [vmem:[%s3944_s1 + $0x288] sm:$0xff]  ;;  %v2204_v14 = vld [vmem:[%s3944_s1 + $0x290] sm:$0xff] }
 0x7b0   :  { %v1188_v30 = vmax.f32 %v1172_v31, %v1178_v37  ;;  %v1189_v50 = vmax.f32 %v1173_v6, %v1179_v15  ;;  %vm1192_vm0 = vcmask 130048   ;;  %vm1266_vm10 = vcmp.gt.s32.totalorder %v3666_v53, 0  ;;  %v2199_v6 = vld [vmem:[%s3944_s1 + $0x268] sm:$0xff]  ;;  %v2205_v51 = vld [vmem:[%s3944_s1 + $0x298] sm:$0xff]  ;;  %v2190_v15 = vld [vmem:[%s3946_s3 + $0x10] ss:$0 sm:$0xff] }
 0x7b1   :  { %v2886_v31 = vpack.c.bf16 %v2199_v6, %v2198_v5  ;;  %v2889_v9 = vpack.c.bf16 %v2201_v8, %v2200_v7  ;;  %v2892_v13 = vpack.c.bf16 %v2203_v12, %v2202_v11  ;;  %v2895_v37 = vpack.c.bf16 %v2205_v51, %v2204_v14 }
 0x7b2   :  { %v1190_v20 = vmax.f32 %v1188_v30, %v1186_v16  ;;  %v1191_v21 = vmax.f32 %v1189_v50, %v1187_v17  ;;  %v2192_v50 = vld [vmem:[%s3946_s3 + $0x11] ss:$0 sm:$0xff]  ;;  %vm2073_vm15 = vcmask 26626  }
 0x7b3   :  { %2887 = vmatpush3.bf16.msra.mxu0 %v2886_v31  ;;  %v1585_v31 = vand.u32 1, %v3046_v10 }
 0x7b4   :  { %v2859_v22 = vpack.c.bf16 %v1191_v21, %v1190_v20  ;;  %2888 = vmatprep.subr.bf16.mxu0 %v2990_v0  ;;  %v2193_v20 = vld [vmem:[%s3946_s3 + $0x12] ss:$0 sm:$0xff] }
 0x7b5   :  { %vm3806_vm13 = vcmp.lt.s32.totalorder %v1585_v31, 1  ;;  %vm3814_vm14 = vcmp.gt.s32.totalorder %v1585_v31, 0 }
 0x7b6   :  { %2860 = vmatpush3.bf16.msra.mxu1 %v2859_v22 }
 0x7b7   :  { %2861 = vmatprep.subr.bf16.mxu1 %v2990_v0  ;;  %2890 = vmatpush3.bf16.msra.mxu0 %v2889_v9  ;;  %v1828_v9 = vld [vmem:[%s3947_s4 + $0x18] sm:$0xff] }
 0x7b8   :  { %2891 = vmatprep.subr.bf16.mxu0 %v2990_v0 }
 0x7b9   :  { %2580 = vmatmul.mubr.msk.f32.vlgmr.msra.gmra.mrb[8].mxu1 %vm1192_vm0, %v3380_v40 }
 0x7ba   :  { %2606 = vmatprep.mubr.msk.f32.mxu1 %vm2991_vm1, %v2989_v35  ;;  %2863 = vmatpush3.bf16.msra.mxu1 %v2862_v24 }
 0x7bb   :  { %2864 = vmatprep.subr.bf16.mxu1 %v2990_v0  ;;  %2893 = vmatpush3.bf16.msra.mxu0 %v2892_v13 }
 0x7bc   :  { %2894 = vmatprep.subr.bf16.mxu0 %v2990_v0 }
 0x7be   :  { %2866 = vmatpush3.bf16.msra.mxu1 %v2865_v29 }
 0x7bf   :  { %2867 = vmatprep.subr.bf16.mxu1 %v2990_v0  ;;  %2896 = vmatpush3.bf16.msra.mxu0 %v2895_v37 }
 0x7c0   :  { %2915 = vmatprep.subr.bf16.mxu0 %v2990_v0 }
 0x7c2   :  { %2869 = vmatpush3.bf16.msra.mxu1 %v2868_v28 }
 0x7c3   :  { %2870 = vmatprep.subr.bf16.mxu1 %v2990_v0 }
 0x7c6   :  { %2872 = vmatpush3.bf16.msra.mxu1 %v2871_v44 }
 0x7c7   :  { %2873 = vmatprep.subr.bf16.mxu1 %v2990_v0 }
 0x7ca   :  { %2875 = vmatpush3.bf16.msra.mxu1 %v2874_v48 }
 0x7cb   :  { %2876 = vmatprep.subr.bf16.mxu1 %v2990_v0 }
 0x7ce   :  { %2878 = vmatpush3.bf16.msra.mxu1 %v2877_v39 }
 0x7cf   :  { %2636 = vmatprep.subr.mxu1 %v2989_v35 }
 0x88c   :  { %v3659_v42 = vpop.f32.mrb[8].mxu1 }
 0x88d   :  { %v1273_v49 = vmul.f32 %v2176_v41, %v3659_v42  ;;  %v2581_v52 = vpop.f32.mrb[9].mxu1 }
 0x88e   :  { %v2213_v52 = vld [vmem:[%s3944_s1 + $0x2b0] sm:$0xff] }
 0x88f   :  { %v1279_v54 = vadd.f32 %v2177_v46, %v1273_v49  ;;  %v2212_v49 = vld [vmem:[%s3944_s1 + $0x2a8] sm:$0xff] }
 0x891   :  { %v1280_v55 = vmax.f32 %v1279_v54, 0.0 }
 0x893   :  { %1286 = vrot.lane.b32.xlu0 %v1280_v55, %s2987_s27  ;;  %v1283_v18 = vrot.slane %v1280_v55, 1  ;;  %v1281_v57 = vrot.slane %v1280_v55, 7  ;;  %v2215_v55 = vld [vmem:[%s3944_s1 + $0x2c0] sm:$0xff] }
 0x895   :  { %v1284_v56 = vsel %vm1267_vm9, %v1283_v18, 0.0  ;;  %v1282_v60 = vsel %vm1266_vm10, %v1281_v57, 0.0  ;;  %v2216_v18 = vld [vmem:[%s3944_s1 + $0x2c8] sm:$0xff]  ;;  %v2217_v57 = vld [vmem:[%s3944_s1 + $0x2d0] sm:$0xff] }
 0x896   :  { %1290 = vrot.lane.b32.xlu1 %v1284_v56, %s2988_s17  ;;  %v2904_v56 = vpack.c.bf16 %v2216_v18, %v2215_v55 }
 0x905   :  { %v1287_v58 = vpop.permute.xlu0 %1286 }
 0x906   :  { %v1293_v61 = vsel %vm103_vm5, %v1282_v60, %v1287_v58  ;;  %v2218_v58 = vld [vmem:[%s3944_s1 + $0x2d8] sm:$0xff] }
 0x907   :  { %v2907_v60 = vpack.c.bf16 %v2218_v58, %v2217_v57 }
 0x908   :  { %v1291_v19 = vpop.permute.xlu1 %1290 }
 0x909   :  { %v1294_v27 = vsel %vm108_vm6, %v1293_v61, %v1291_v19  ;;  %v2219_v61 = vld [vmem:[%s3944_s1 + $0x2e0] sm:$0xff]  ;;  %v2220_v19 = vld [vmem:[%s3944_s1 + $0x2e8] sm:$0xff] }
 0x90a   :  { %2607 = vmatmul.mubr.msk.f32.vlgmr.msra.gmra.mrb[10].mxu1 %vm130_vm7, %v1294_v27  ;;  %v2910_v27 = vpack.c.bf16 %v2220_v19, %v2219_v61  ;;  %v1832_v61 = vld [vmem:[%s3947_s4 + $0x30] sm:$0xff]  ;;  %v1833_v19 = vld [vmem:[%s3947_s4 + $0x38] sm:$0xff] }
 0x90b   :  { %2638 = vmatprep.mubr.msk.f32.mxu1 %vm2991_vm1, %v2989_v35 }
 0x9dd   :  { %v1382_v30 = vpop.f32.mrb[10].mxu1 }
 0x9de   :  { %v1383_v16 = vadd.f32 %v2190_v15, %v1382_v30  ;;  %v2608_v17 = vpop.f32.mrb[11].mxu1 }
 0x9df   :  { %v2229_v17 = vld [vmem:[%s3944_s1 + $0x310] sm:$0xff] }
 0x9e0   :  { %v1391_v21 = vmul.f32 %v2192_v50, %v1383_v16  ;;  %v2227_v50 = vld [vmem:[%s3944_s1 + $0x300] sm:$0xff]  ;;  %v2228_v16 = vld [vmem:[%s3944_s1 + $0x308] sm:$0xff] }
 0x9e2   :  { %v1397_v22 = vadd.f32 %v2193_v20, %v1391_v21  ;;  %v2916_v20 = vpack.c.bf16 %v2228_v16, %v2227_v50  ;;  %v2230_v21 = vld [vmem:[%s3944_s1 + $0x318] sm:$0xff] }
 0x9e4   :  { %v1398_v43 = vmax.f32 %v1397_v22, 0.0  ;;  %v2919_v22 = vpack.c.bf16 %v2230_v21, %v2229_v17 }
 0x9e6   :  { %1404 = vrot.lane.b32.xlu0 %v1398_v43, %s2987_s27  ;;  %v1401_v45 = vrot.slane %v1398_v43, 1  ;;  %v1399_v24 = vrot.slane %v1398_v43, 7  ;;  %v2231_v43 = vld [vmem:[%s3944_s1 + $0x320] sm:$0xff] }
 0x9e8   :  { %v1402_v23 = vsel %vm1267_vm9, %v1401_v45, 0.0  ;;  %v1400_v29 = vsel %vm1266_vm10, %v1399_v24, 0.0  ;;  %v2232_v45 = vld [vmem:[%s3944_s1 + $0x328] sm:$0xff]  ;;  %v2233_v24 = vld [vmem:[%s3944_s1 + $0x330] sm:$0xff] }
 0x9e9   :  { %1408 = vrot.lane.b32.xlu1 %v1402_v23, %s2988_s17  ;;  %v2922_v23 = vpack.c.bf16 %v2232_v45, %v2231_v43 }
 0xa58   :  { %v1405_v26 = vpop.permute.xlu0 %1404 }
 0xa59   :  { %v1411_v33 = vsel %vm103_vm5, %v1400_v29, %v1405_v26  ;;  %v2234_v26 = vld [vmem:[%s3944_s1 + $0x338] sm:$0xff] }
 0xa5a   :  { %v2925_v29 = vpack.c.bf16 %v2234_v26, %v2233_v24 }
 0xa5b   :  { %v1409_v59 = vpop.permute.xlu1 %1408 }
 0xa5c   :  { %v1412_v28 = vsel %vm108_vm6, %v1411_v33, %v1409_v59  ;;  %v2235_v33 = vld [vmem:[%s3944_s1 + $0x340] sm:$0xff]  ;;  %v2236_v59 = vld [vmem:[%s3944_s1 + $0x348] sm:$0xff] }
 0xa5d   :  { %2634 = vmatmul.mubr.msk.f32.vlgmr.msra.gmra.mrb[10].mxu0 %vm130_vm7, %v1412_v28  ;;  %v2928_v28 = vpack.c.bf16 %v2236_v59, %v2235_v33 }
 0xa5e   :  { %2692 = vmatprep.mubr.msk.f32.mxu0 %vm2991_vm1, %v2989_v35  ;;  %2917 = vmatpush3.bf16.msra.mxu0 %v2916_v20 }
 0xa5f   :  { %2918 = vmatprep.subr.bf16.mxu0 %v2990_v0 }
 0xa62   :  { %2920 = vmatpush3.bf16.msra.mxu0 %v2919_v22 }
 0xa63   :  { %2921 = vmatprep.subr.bf16.mxu0 %v2990_v0 }
 0xa66   :  { %2923 = vmatpush3.bf16.msra.mxu0 %v2922_v23 }
 0xa67   :  { %2924 = vmatprep.subr.bf16.mxu0 %v2990_v0 }
 0xa6a   :  { %2926 = vmatpush3.bf16.msra.mxu0 %v2925_v29 }
 0xa6b   :  { %2927 = vmatprep.subr.bf16.mxu0 %v2990_v0 }
 0xa6e   :  { %2929 = vmatpush3.bf16.msra.mxu0 %v2928_v28 }
 0xa6f   :  { %2930 = vmatprep.subr.bf16.mxu0 %v2990_v0 }
 0xb30   :  { %v1500_v38 = vpop.f32.mrb[10].mxu0 }
 0xb31   :  { %v1501_v44 = vadd.f32 %v2206_v32, %v1500_v38  ;;  %v2635_v3 = vpop.f32.mrb[11].mxu0  ;;  %v2237_v32 = vld [vmem:[%s3944_s1 + $0x350] sm:$0xff]  ;;  %v2238_v38 = vld [vmem:[%s3944_s1 + $0x358] sm:$0xff] }
 0xb32   :  { %v2223_v3 = vld [vmem:[%s3946_s3 + $0x16] ss:$0 sm:$0xff] }
 0xb33   :  { %v1504_v47 = vadd.f32 %v1501_v44, %v3659_v42  ;;  %v2211_v42 = vld [vmem:[%s3944_s1 + $0x2a0] sm:$0xff]  ;;  %v2931_v44 = vpack.c.bf16 %v2238_v38, %v2237_v32 }
 0xb34   :  { %v2898_v53 = vpack.c.bf16 %v2212_v49, %v2211_v42  ;;  %v2226_v42 = vld [vmem:[%s3946_s3 + $0x18] ss:$0 sm:$0xff] }
 0xb35   :  { %v1505_v48 = vrot.slane %v1504_v47, 1  ;;  %v1508_v34 = vrot.slane %v1504_v47, 2  ;;  %2932 = vmatpush3.bf16.msra.mxu0 %v2931_v44 }
 0xb36   :  { %2717 = vmatprep.subr.mxu0 %v2989_v35 }
 0xb37   :  { %v1506_v36 = vsel %vm1267_vm9, %v1505_v48, 0.0  ;;  %v1509_v41 = vsel %vm1507_vm11, %v1508_v34, 0.0  ;;  %v2225_v48 = vld [vmem:[%s3946_s3 + $0x17] ss:$0 sm:$0xff]  ;;  %v1830_v34 = vld [vmem:[%s3947_s4 + $0x20] sm:$0xff] }
 0xb38   :  { %v1510_v39 = vmax.f32 %v1504_v47, %v1506_v36  ;;  %v1831_v36 = vld [vmem:[%s3947_s4 + $0x28] sm:$0xff] }
 0xb3a   :  { %v1511_v46 = vmax.f32 %v1510_v39, %v1509_v41 }
 0xb3c   :  { %2637 = vmatpush3.msra.mxu1 %v1511_v46  ;;  %v2934_v46 = vpack.c.bf16 %v1831_v36, %v1830_v34 }
 0xb3d   :  { %2639 = vmatmul.mubr.msk.f32.vlgmr.msra.gmra.mrb[12].mxu1 %vm1512_vm12, %v3380_v40  ;;  %2897 = vmatprep.subr.bf16.mxu1 %v2990_v0  ;;  %v2214_v40 = vld [vmem:[%s3944_s1 + $0x2b8] sm:$0xff] }
 0xb3e   :  { %2665 = vmatprep.mubr.msk.f32.mxu1 %vm2991_vm1, %v2989_v35  ;;  %2899 = vmatpush3.bf16.msra.mxu1 %v2898_v53  ;;  %v2901_v54 = vpack.c.bf16 %v2214_v40, %v2213_v52 }
 0xb3f   :  { %2900 = vmatprep.subr.bf16.mxu1 %v2990_v0 }
 0xb42   :  { %2902 = vmatpush3.bf16.msra.mxu1 %v2901_v54 }
 0xb43   :  { %2903 = vmatprep.subr.bf16.mxu1 %v2990_v0 }
 0xb46   :  { %2905 = vmatpush3.bf16.msra.mxu1 %v2904_v56 }
 0xb47   :  { %2906 = vmatprep.subr.bf16.mxu1 %v2990_v0 }
 0xb4a   :  { %2908 = vmatpush3.bf16.msra.mxu1 %v2907_v60 }
 0xb4b   :  { %2909 = vmatprep.subr.bf16.mxu1 %v2990_v0 }
 0xb4e   :  { %2911 = vmatpush3.bf16.msra.mxu1 %v2910_v27  ;;  %v2937_v27 = vpack.c.bf16 %v1833_v19, %v1832_v61 }
 0xb4f   :  { %2912 = vmatprep.subr.bf16.mxu1 %v2990_v0 }
 0xb52   :  { %2914 = vmatpush3.bf16.msra.mxu1 %v2913_v1 }
 0xb53   :  { %2933 = vmatprep.subr.bf16.mxu1 %v2990_v0 }
 0xc10   :  { %v3799_v25 = vpop.f32.mrb[12].mxu1 }
 0xc11   :  { %v1593_v5 = vmul.f32 %v2209_v2, %v3799_v25  ;;  %v2640_v6 = vpop.f32.mrb[13].mxu1 }
 0xc13   :  { %v1599_v7 = vadd.f32 %v2210_v4, %v1593_v5  ;;  %v1825_v4 = vld [vmem:[%s3947_s4] sm:$0xff]  ;;  %v1826_v5 = vld [vmem:[%s3947_s4 + $0x8] sm:$0xff] }
 0xc14   :  { %v2940_v31 = vpack.c.bf16 %v1826_v5, %v1825_v4 }
 0xc15   :  { %v1600_v8 = vmax.f32 %v1599_v7, 0.0 }
 0xc17   :  { %1606 = vrot.lane.b32.xlu0 %v1600_v8, %s2987_s27  ;;  %v1603_v11 = vrot.slane %v1600_v8, 1  ;;  %v1601_v13 = vrot.slane %v1600_v8, 7  ;;  %v1827_v8 = vld [vmem:[%s3947_s4 + $0x10] sm:$0xff] }
 0xc19   :  { %v1604_v12 = vsel %vm3806_vm13, %v1603_v11, 0.0  ;;  %v1602_v51 = vsel %vm3814_vm14, %v1601_v13, 0.0  ;;  %v2943_v11 = vpack.c.bf16 %v1828_v9, %v1827_v8 }
 0xc1a   :  { %1610 = vrot.lane.b32.xlu1 %v1604_v12, %s2988_s17 }
 0xc89   :  { %v1607_v10 = vpop.permute.xlu0 %1606 }
 0xc8a   :  { %v1613_v37 = vsel %vm103_vm5, %v1602_v51, %v1607_v10  ;;  %v2243_v10 = vld [vmem:[%s3948_s5] ss:$0 sm:$0xff] }
 0xc8c   :  { %v1611_v15 = vpop.permute.xlu1 %1610 }
 0xc8d   :  { %v1614_v30 = vsel %vm108_vm6, %v1613_v37, %v1611_v15  ;;  %v2244_v15 = vld [vmem:[%s3948_s5 + $0x5] ss:$0 sm:$0xff] }
 0xc8e   :  { %2666 = vmatmul.mubr.msk.f32.vlgmr.msra.gmra.mrb[14].mxu1 %vm130_vm7, %v1614_v30 }
 0xc8f   :  { %2703 = vmatprep.mubr.msk.f32.mxu1 %vm2991_vm1, %v2989_v35  ;;  %2935 = vmatpush3.bf16.msra.mxu1 %v2934_v46 }
 0xc90   :  { %2936 = vmatprep.subr.bf16.mxu1 %v2990_v0 }
 0xc93   :  { %2938 = vmatpush3.bf16.msra.mxu1 %v2937_v27 }
 0xc94   :  { %2939 = vmatprep.subr.bf16.mxu1 %v2990_v0 }
 0xd61   :  { %v1702_v47 = vpop.f32.mrb[14].mxu1 }
 0xd62   :  { %v1703_v39 = vadd.f32 %v2223_v3, %v1702_v47  ;;  %v2667_v41 = vpop.f32.mrb[15].mxu1 }
 0xd64   :  { %v1711_v49 = vmul.f32 %v2225_v48, %v1703_v39 }
 0xd66   :  { %v1717_v52 = vadd.f32 %v2226_v42, %v1711_v49 }
 0xd68   :  { %v1718_v53 = vmax.f32 %v1717_v52, 0.0 }
 0xd6a   :  { %1724 = vrot.lane.b32.xlu0 %v1718_v53, %s2987_s27  ;;  %v1721_v40 = vrot.slane %v1718_v53, 1  ;;  %v1719_v55 = vrot.slane %v1718_v53, 7 }
 0xd6c   :  { %v1722_v54 = vsel %vm3806_vm13, %v1721_v40, 0.0  ;;  %v1720_v56 = vsel %vm3814_vm14, %v1719_v55, 0.0 }
 0xd6d   :  { %1728 = vrot.lane.b32.xlu1 %v1722_v54, %s2988_s17 }
 0xddc   :  { %v1725_v18 = vpop.permute.xlu0 %1724 }
 0xddd   :  { %v1731_v57 = vsel %vm103_vm5, %v1720_v56, %v1725_v18 }
 0xddf   :  { %v1729_v58 = vpop.permute.xlu1 %1728 }
 0xde0   :  { %v1732_v60 = vsel %vm108_vm6, %v1731_v57, %v1729_v58  ;;  %vm1997_vm6 = vcmask 1043456  }
 0xde1   :  { %2693 = vmatmul.mubr.msk.f32.vlgmr.msra.gmra.mrb[12].mxu0 %vm130_vm7, %v1732_v60  ;;  %vm1993_vm7 = vcmask 31744  }
 0xde2   :  { %2719 = vmatprep.mubr.msk.f32.mxu0 %vm2991_vm1, %v2989_v35 }
 0xeb4   :  { %v1820_v63 = vpop.f32.mrb[12].mxu0 }
 0xeb5   :  { %v1821_v1 = vadd.f32 %v2239_v62, %v1820_v63  ;;  %v2694_v2 = vpop.f32.mrb[13].mxu0 }
 0xeb7   :  { %v1824_v6 = vadd.f32 %v1821_v1, %v3799_v25  ;;  %v1987_v25 = vld [vmem:[%s3948_s5 + $0x1] sm:$0xf] }
 0xeb8   :  { %2718 = vmatpush3.msk.msra.mxu0 %vm1997_vm6, %v1987_v25 }
 0xeb9   :  { %v1829_v7 = vrot.slane %v1824_v6, 1 }
 0xebb   :  { %2704 = vmatmul.mubr.msk.f32.vlgmr.msra.gmra.mrb[16].mxu1 %vm103_vm5, %v1829_v7 }
 0xebc   :  { %2941 = vmatpush3.bf16.msra.mxu1 %v2940_v31  ;;  %2714 = vmatprep.mubr.msk.f32.mxu1 %vm2991_vm1, %v2989_v35 }
 0xebd   :  { %2942 = vmatprep.subr.bf16.mxu1 %v2990_v0 }
 0xec0   :  { %2944 = vmatpush3.bf16.msra.mxu1 %v2943_v11 }
 0xec3   :  { %2715 = vmatmul.mubr.msk.f32.vlgmr.msra.gmra.mrb[18].mxu1 %vm103_vm5, %v1824_v6  ;;  %vm2071_vm5 = vcmask 24576  }
 0xf8e   :  { %v1903_v12 = vpop.f32.mrb[16].mxu1 }
 0xf8f   :  { %v2705_v13 = vpop.f32.mrb[17].mxu1 }
 0xf96   :  { %v1976_v14 = vpop.f32.mrb[18].mxu1 }
 0xf97   :  { %v1977_v51 = vadd.f32 %v1976_v14, %v1903_v12  ;;  %v2716_v35 = vpop.f32.mrb[19].mxu1 }
 0xf99   :  { %v1985_v37 = vadd.f32 %v2243_v10, %v1977_v51 }
 0xf9b   :  { %v1986_v0 = vmax.f32 %v1985_v37, 0.0 }
 0xf9d   :  { %2720 = vmatmul.mubr.msk.f32.vlgmr.msra.gmra.mrb[14].mxu0 %vm1993_vm7, %v1986_v0 }
0x1070   :  { %v2067_v30 = vpop.f32.mrb[14].mxu0 }
0x1071   :  { %v2068_v50 = vadd.f32 %v2244_v15, %v2067_v30  ;;  %v2721_v16 = vpop.f32.mrb[15].mxu0 }
0x1073   :  { %2072 = vst.msk [vmem:[#allocation2] sm:$0x1] %vm2071_vm5, %v2068_v50 }
0x1074   :  { %2074 = vst.msk [vmem:[#allocation2 - $0x1] sm:$0x4] %vm2073_vm15, %v2068_v50 }
0x1075   :  { %2974 = shalt.err (!%p2971_p4)
}
0x1076   :  { %s2975_s5 = scalar_lea.hbm %s3949_s6, 32 }
0x1077   :  { %p2976_p5 = scmp.ne.s32.totalorder %s3949_s6, %s2975_s5  ;;  %p2979_p6 = scmp.lt.u32.totalorder %s2975_s5, %s3949_s6 }
0x1079   :  { %p2981_p7 = pnand %p2979_p6, %p2976_p5 }
0x107b   :  { %2984 = shalt.err (!%p2981_p7)
}
0x107c   :  { %2084 = dma.vmem_to_hbm [thread:$0]  %s2082_s14, 32, %s3949_s6, [#allocation3]  }
0x107d   :  { %2985 = dma.done.wait [#allocation3], 32  }
0x107e   :  { %2986 = vsyncadd [#allocation3], 4294967264 }
0x107f   :  { %2088 = vsyncpa [#allocation3], 1 }

</bundles_post_ra>
